<compile_context>
chip_gen: v7x
topology: tpu7x:2x2x1
jax: 0.10.0
libtpu: 0.0.40
codegen_flags: <defaults>
</compile_context>

<pallas_src>
import functools
import math

import jax
import jax.numpy as jnp
from jax.experimental import pallas as pl
from jax.experimental.pallas import tpu as pltpu


def _layernorm(z, gamma, beta, eps=1e-5):
    mean = jnp.mean(z, axis=-1, keepdims=True)
    zc = z - mean
    var = jnp.mean(zc * zc, axis=-1, keepdims=True)
    return zc * jax.lax.rsqrt(var + eps) * gamma + beta


def encoder_block_kernel(
    xq_ref,       # (1, TQ, H) f32   query rows of x (also the residual path)
    xkv_ref,      # (1, S,  H) bf16  full sequence row (source of K/V)
    wq_ref, wk_ref, wv_ref, wo_ref,        # (H, H) bf16 each; wq pre-scaled by 1/sqrt(dh)
    w1_ref, b1_ref, w2_ref, b2_ref,        # (H, F) bf16, (1, F) f32, (F, H) bf16, (1, H) f32
    g1_ref, be1_ref, g2_ref, be2_ref,      # LayerNorm params, (1, H) f32 each
    o_ref,        # (1, TQ, H)
    k_scratch,    # (nh, S, dh) bf16 VMEM scratch — cached keys for this batch row
    v_scratch,    # (nh, S, dh) bf16 VMEM scratch — cached values for this batch row
    *, num_heads, kv_tile, compute_dtype,
):
    cd = compute_dtype
    x_q = xq_ref[0]                   # (TQ, H) f32
    TQ, H = x_q.shape
    S = xkv_ref.shape[1]
    dh = H // num_heads
    n_kv = S // kv_tile

    # ---- Project K/V once per batch row; cache pre-split in VMEM scratch ----
    @pl.when(pl.program_id(1) == 0)
    def _project_kv():
        xkv = xkv_ref[0]              # (S, H) bf16
        k = jnp.dot(xkv, wk_ref[...], preferred_element_type=jnp.float32).astype(cd)
        v = jnp.dot(xkv, wv_ref[...], preferred_element_type=jnp.float32).astype(cd)
        k_scratch[...] = pltpu.einshape("shd->hsd", k.reshape(S, num_heads, dh))
        v_scratch[...] = pltpu.einshape("shd->hsd", v.reshape(S, num_heads, dh))

    # ---- Q projection (1/sqrt(dh) already folded into W_q in the wrapper) ----
    q = jnp.dot(x_q.astype(cd), wq_ref[...], preferred_element_type=jnp.float32)
    qh = pltpu.einshape("shd->hsd", q.astype(cd).reshape(TQ, num_heads, dh))  # (nh,TQ,dh)

    # ---- Online-softmax (flash) attention over K/V tiles --------------------
    def attend(carry, k_blk, v_blk):
        m, l, acc = carry
        s = jnp.einsum("hqd,hkd->hqk", qh, k_blk,
                       preferred_element_type=jnp.float32)        # (nh, TQ, TK) f32
        m_new = jnp.maximum(m, jnp.max(s, axis=-1, keepdims=True))
        alpha = jnp.exp(m - m_new)
        p = jnp.exp(s - m_new)
        l_new = alpha * l + jnp.sum(p, axis=-1, keepdims=True)
        acc_new = alpha * acc + jnp.einsum(
            "hqk,hkd->hqd", p.astype(cd), v_blk,
            preferred_element_type=jnp.float32)                   # (nh, TQ, dh) f32
        return m_new, l_new, acc_new

    carry = (jnp.full((num_heads, TQ, 1), -jnp.inf, jnp.float32),
             jnp.zeros((num_heads, TQ, 1), jnp.float32),
             jnp.zeros((num_heads, TQ, dh), jnp.float32))

    if n_kv <= 8:
        # Short, statically known tile count: unroll with static ref slices.
        for j in range(n_kv):
            lo = j * kv_tile
            carry = attend(carry,
                           k_scratch[:, lo:lo + kv_tile, :],
                           v_scratch[:, lo:lo + kv_tile, :])
    else:
        def kv_step(i, c):
            start = pl.multiple_of(i * kv_tile, kv_tile)
            return attend(c,
                          k_scratch[:, pl.ds(start, kv_tile), :],
                          v_scratch[:, pl.ds(start, kv_tile), :])
        carry = jax.lax.fori_loop(0, n_kv, kv_step, carry)
    m_i, l_i, acc = carry

    # TODO(synk): attention / AddNorm dropout is a no-op here (eval mode).
    ctx = acc * pl.reciprocal(l_i, approx=True)                   # (nh, TQ, dh) f32
    att = pltpu.einshape("hsd->shd", ctx.astype(cd)).reshape(TQ, H)
    att = jnp.dot(att, wo_ref[...], preferred_element_type=jnp.float32)

    # ---- AddNorm 1 (f32) -----------------------------------------------------
    y = _layernorm(att + x_q, g1_ref[...], be1_ref[...])

    # ---- Position-wise FFN (bf16 matmuls, f32 bias/accum) ---------------------
    # TODO(synk): for very large H/F on v7x (64 MiB VMEM), stream w1/w2 from HBM
    # in F-chunks (extra grid axis or pltpu.emit_pipeline) instead of keeping
    # them resident.
    h1 = jnp.dot(y.astype(cd), w1_ref[...], preferred_element_type=jnp.float32) + b1_ref[...]
    h1 = jnp.maximum(h1, 0.0)
    ffn = jnp.dot(h1.astype(cd), w2_ref[...], preferred_element_type=jnp.float32) + b2_ref[...]

    # ---- AddNorm 2 (f32) ------------------------------------------------------
    out = _layernorm(ffn + y, g2_ref[...], be2_ref[...])
    o_ref[0] = out.astype(o_ref.dtype)


def _pick_tile(S, max_tile):
    """Largest tile <= max_tile that divides S; prefer multiples of 128, then 8."""
    if S <= max_tile:
        return S
    for align in (128, 8):
        for t in range(min(max_tile, S), align - 1, -1):
            if S % t == 0 and t % align == 0:
                return t
    return S


def _vmem_limit_bytes(frac=0.85, fallback=64 * 1024 * 1024):
    """Generation-aware VMEM budget with headroom for compiler scratch."""
    try:
        cap = getattr(pltpu.get_tpu_info(), "vmem_capacity_bytes", None)
    except Exception:
        cap = None
    if not cap:
        return fallback
    return min(int(cap * frac), 110 * 1024 * 1024)


def encoder_block(x, params, num_heads, *, q_tile=256, kv_tile=512,
                  compute_dtype=jnp.bfloat16):
    B, S, H = x.shape
    F = params["w1"].shape[1]
    assert H % num_heads == 0
    dh = H // num_heads

    TQ = _pick_tile(S, q_tile)
    TK = _pick_tile(S, kv_tile)
    assert S % TQ == 0 and S % TK == 0
    n_q = S // TQ

    cd = compute_dtype
    f32 = jnp.float32
    # Fold 1/sqrt(dh) into W_q once (removes a per-step VPU multiply).
    wq = (params["wq"] * (1.0 / math.sqrt(dh))).astype(cd)
    wk = params["wk"].astype(cd)
    wv = params["wv"].astype(cd)
    wo = params["wo"].astype(cd)
    w1 = params["w1"].astype(cd)
    w2 = params["w2"].astype(cd)
    b1 = params["b1"].astype(f32)
    b2 = params["b2"].astype(f32)
    g1 = params["g1"].astype(f32)
    be1 = params["be1"].astype(f32)
    g2 = params["g2"].astype(f32)
    be2 = params["be2"].astype(f32)

    # K/V stream is fed in bf16 (cast once here); query/residual stream stays f32.
    x_kv = x.astype(cd)

    def _spec(shape, idx):
        try:
            # Block index rarely/never changes across the grid -> single-buffer
            # to halve its VMEM residency.
            return pl.BlockSpec(shape, idx, pipeline_mode=pl.Buffered(1))
        except (AttributeError, TypeError):
            return pl.BlockSpec(shape, idx)

    def _const(shape):
        return _spec(shape, lambda *_: (0,) * len(shape))

    in_specs = [
        pl.BlockSpec((1, TQ, H), lambda b, qi: (b, qi, 0)),   # query rows / residual (f32)
        _spec((1, S, H), lambda b, qi: (b, 0, 0)),            # full row for K/V (bf16)
        _const((H, H)), _const((H, H)),
        _const((H, H)), _const((H, H)),
        _const((H, F)), _const((1, F)),
        _const((F, H)), _const((1, H)),
        _const((1, H)), _const((1, H)),
        _const((1, H)), _const((1, H)),
    ]
    out_spec = pl.BlockSpec((1, TQ, H), lambda b, qi: (b, qi, 0))

    kernel = functools.partial(
        encoder_block_kernel, num_heads=num_heads, kv_tile=TK, compute_dtype=cd)

    return pl.pallas_call(
        kernel,
        out_shape=jax.ShapeDtypeStruct((B, S, H), x.dtype),
        grid_spec=pltpu.PrefetchScalarGridSpec(
            num_scalar_prefetch=0,
            grid=(B, n_q),
            in_specs=in_specs,
            out_specs=out_spec,
            scratch_shapes=[
                pltpu.VMEM((num_heads, S, dh), cd),   # cached K for the current batch row
                pltpu.VMEM((num_heads, S, dh), cd),   # cached V for the current batch row
            ],
        ),
        compiler_params=pltpu.CompilerParams(
            # qi must run sequentially on-core so the K/V scratch computed at
            # qi == 0 is valid for every later query tile of the same batch row.
            dimension_semantics=("parallel", "arbitrary"),
            vmem_limit_bytes=_vmem_limit_bytes(),
        ),
    )(x, x_kv, wq, wk, wv, wo, w1, b1, w2, b2, g1, be1, g2, be2)


def encoder_block_ref(x, params, num_heads):
    """Pure-JAX f32 reference mirroring the PyTorch forward (eval mode)."""
    B, S, H = x.shape
    dh = H // num_heads

    q = x @ params["wq"]
    k = x @ params["wk"]
    v = x @ params["wv"]

    def split(t):  # (B, S, H) -> (B, nh, S, dh)
        return t.reshape(B, S, num_heads, dh).transpose(0, 2, 1, 3)

    qh, kh, vh = split(q), split(k), split(v)
    scores = jnp.einsum("bhqd,bhkd->bhqk", qh, kh) / math.sqrt(dh)
    p = jax.nn.softmax(scores, axis=-1)
    ctx = jnp.einsum("bhqk,bhkd->bhqd", p, vh)
    att = ctx.transpose(0, 2, 1, 3).reshape(B, S, H) @ params["wo"]

    def ln(z, g, b, eps=1e-5):
        m = jnp.mean(z, axis=-1, keepdims=True)
        var = jnp.mean((z - m) ** 2, axis=-1, keepdims=True)
        return (z - m) * jax.lax.rsqrt(var + eps) * g + b

    y = ln(att + x, params["g1"], params["be1"])
    h = jnp.maximum(y @ params["w1"] + params["b1"], 0.0)
    f = h @ params["w2"] + params["b2"]
    return ln(f + y, params["g2"], params["be2"])


def _make_params(key, H, F, scale=0.1):
    ks = jax.random.split(key, 12)
    return {
        # Linear weights stored pre-transposed as (in, out) so y = x @ W.
        "wq": scale * jax.random.normal(ks[0], (H, H), jnp.float32),
        "wk": scale * jax.random.normal(ks[1], (H, H), jnp.float32),
        "wv": scale * jax.random.normal(ks[2], (H, H), jnp.float32),
        "wo": scale * jax.random.normal(ks[3], (H, H), jnp.float32),
        "w1": scale * jax.random.normal(ks[4], (H, F), jnp.float32),
        "b1": scale * jax.random.normal(ks[5], (1, F), jnp.float32),
        "w2": scale * jax.random.normal(ks[6], (F, H), jnp.float32),
        "b2": scale * jax.random.normal(ks[7], (1, H), jnp.float32),
        "g1": 1.0 + 0.05 * jax.random.normal(ks[8], (1, H), jnp.float32),
        "be1": 0.05 * jax.random.normal(ks[9], (1, H), jnp.float32),
        "g2": 1.0 + 0.05 * jax.random.normal(ks[10], (1, H), jnp.float32),
        "be2": 0.05 * jax.random.normal(ks[11], (1, H), jnp.float32),
    }


if __name__ == "__main__":
    # ---- Small config (single query tile, single K/V tile) -------------------
    B, S, H, num_heads, F = 2, 8, 32, 4, 64
    key = jax.random.PRNGKey(0)
    kp, kx, kp2, kx2 = jax.random.split(key, 4)

    params = _make_params(kp, H, F)
    x = jax.random.normal(kx, (B, S, H), jnp.float32)

    out = jax.block_until_ready(encoder_block(x, params, num_heads))
    ref = encoder_block_ref(x, params, num_heads)
    assert out.shape == (B, S, H)
    err = jnp.max(jnp.abs(out - ref))
    # Tolerance accounts for bf16 matmuls (f32 accumulation) + approx reciprocal.
    assert jnp.allclose(out, ref, atol=3e-2, rtol=3e-2), f"max abs err = {err}"

    # ---- Larger config: exercises K/V caching across query tiles (n_q = 2)
    # ---- and the online-softmax accumulation over multiple K/V tiles (n_kv = 2).
    B2, S2, H2, nh2, F2 = 1, 256, 64, 4, 128
    params2 = _make_params(kp2, H2, F2)
    x2 = jax.random.normal(kx2, (B2, S2, H2), jnp.float32)

    out2 = jax.block_until_ready(
        encoder_block(x2, params2, nh2, q_tile=128, kv_tile=128))
    ref2 = encoder_block_ref(x2, params2, nh2)
    err2 = jnp.max(jnp.abs(out2 - ref2))
    assert jnp.allclose(out2, ref2, atol=3e-2, rtol=3e-2), f"max abs err = {err2}"

    print("KERNEL_OK")
</pallas_src>

<mosaic_0001>
module attributes {stable_mosaic.version = 11 : i64} {
  func.func @encoder_block_kernel(%arg0: i32, %arg1: i32, %arg2: memref<1x8x32xf32, #tpu.memory_space<vmem>>, %arg3: memref<1x8x32xbf16, #tpu.memory_space<vmem>>, %arg4: memref<32x32xbf16, #tpu.memory_space<vmem>>, %arg5: memref<32x32xbf16, #tpu.memory_space<vmem>>, %arg6: memref<32x32xbf16, #tpu.memory_space<vmem>>, %arg7: memref<32x32xbf16, #tpu.memory_space<vmem>>, %arg8: memref<32x64xbf16, #tpu.memory_space<vmem>>, %arg9: memref<1x64xf32, #tpu.memory_space<vmem>>, %arg10: memref<64x32xbf16, #tpu.memory_space<vmem>>, %arg11: memref<1x32xf32, #tpu.memory_space<vmem>>, %arg12: memref<1x32xf32, #tpu.memory_space<vmem>>, %arg13: memref<1x32xf32, #tpu.memory_space<vmem>>, %arg14: memref<1x32xf32, #tpu.memory_space<vmem>>, %arg15: memref<1x32xf32, #tpu.memory_space<vmem>>, %arg16: memref<1x8x32xf32, #tpu.memory_space<vmem>>, %arg17: memref<4x8x8xbf16, #tpu.memory_space<vmem>>, %arg18: memref<4x8x8xbf16, #tpu.memory_space<vmem>>) attributes {dimension_semantics = [#tpu.dimension_semantics<parallel>, #tpu.dimension_semantics<arbitrary>], iteration_bounds = array<i64: 2, 1>, scalar_prefetch = 0 : i64, scratch_operands = 2 : i64, tpu.core_type = #tpu.core_type<tc>, window_params = [{transform_indices = @transform_0, window_bounds = array<i64: 1, 8, 32>}, {pipeline_mode = #tpu.pipeline_mode<synchronous>, transform_indices = @transform_1, window_bounds = array<i64: 1, 8, 32>}, {pipeline_mode = #tpu.pipeline_mode<synchronous>, transform_indices = @transform_2, window_bounds = array<i64: 32, 32>}, {pipeline_mode = #tpu.pipeline_mode<synchronous>, transform_indices = @transform_3, window_bounds = array<i64: 32, 32>}, {pipeline_mode = #tpu.pipeline_mode<synchronous>, transform_indices = @transform_4, window_bounds = array<i64: 32, 32>}, {pipeline_mode = #tpu.pipeline_mode<synchronous>, transform_indices = @transform_5, window_bounds = array<i64: 32, 32>}, {pipeline_mode = #tpu.pipeline_mode<synchronous>, transform_indices = @transform_6, window_bounds = array<i64: 32, 64>}, {pipeline_mode = #tpu.pipeline_mode<synchronous>, transform_indices = @transform_7, window_bounds = array<i64: 1, 64>}, {pipeline_mode = #tpu.pipeline_mode<synchronous>, transform_indices = @transform_8, window_bounds = array<i64: 64, 32>}, {pipeline_mode = #tpu.pipeline_mode<synchronous>, transform_indices = @transform_9, window_bounds = array<i64: 1, 32>}, {pipeline_mode = #tpu.pipeline_mode<synchronous>, transform_indices = @transform_10, window_bounds = array<i64: 1, 32>}, {pipeline_mode = #tpu.pipeline_mode<synchronous>, transform_indices = @transform_11, window_bounds = array<i64: 1, 32>}, {pipeline_mode = #tpu.pipeline_mode<synchronous>, transform_indices = @transform_12, window_bounds = array<i64: 1, 32>}, {pipeline_mode = #tpu.pipeline_mode<synchronous>, transform_indices = @transform_13, window_bounds = array<i64: 1, 32>}, {transform_indices = @transform_14, window_bounds = array<i64: 1, 8, 32>}]} {
    %c0 = arith.constant 0 : index
    %c0_0 = arith.constant 0 : index
    %c0_1 = arith.constant 0 : index
    %0 = vector.load %arg2[%c0, %c0_0, %c0_1] : memref<1x8x32xf32, #tpu.memory_space<vmem>>, vector<1x8x32xf32>
    %1 = vector.shape_cast %0 : vector<1x8x32xf32> to vector<8x32xf32>
    %c0_i32 = arith.constant 0 : i32
    %2 = arith.cmpi eq, %arg1, %c0_i32 : i32
    %3 = arith.extui %2 : i1 to i32
    %c0_i32_2 = arith.constant 0 : i32
    %4 = arith.cmpi ne, %3, %c0_i32_2 : i32
    scf.if %4 {
      %c0_53 = arith.constant 0 : index
      %c0_54 = arith.constant 0 : index
      %c0_55 = arith.constant 0 : index
      %105 = vector.load %arg3[%c0_53, %c0_54, %c0_55] : memref<1x8x32xbf16, #tpu.memory_space<vmem>>, vector<1x8x32xbf16>
      %106 = vector.shape_cast %105 : vector<1x8x32xbf16> to vector<8x32xbf16>
      %c0_56 = arith.constant 0 : index
      %c0_57 = arith.constant 0 : index
      %107 = vector.load %arg5[%c0_56, %c0_57] : memref<32x32xbf16, #tpu.memory_space<vmem>>, vector<32x32xbf16>
      %cst_58 = arith.constant dense<0.000000e+00> : vector<8x32xf32>
      %108 = tpu.matmul %106, %107, %cst_58 {dimension_numbers = #tpu.dot_dimension_numbers<[1], [0], [0], [1], [0, 0, 1, 1], [], []>} : vector<8x32xbf16>, vector<32x32xbf16>, vector<8x32xf32> -> vector<8x32xf32>
      %109 = arith.truncf %108 : vector<8x32xf32> to vector<8x32xbf16>
      %c0_59 = arith.constant 0 : index
      %c0_60 = arith.constant 0 : index
      %110 = vector.load %arg6[%c0_59, %c0_60] : memref<32x32xbf16, #tpu.memory_space<vmem>>, vector<32x32xbf16>
      %cst_61 = arith.constant dense<0.000000e+00> : vector<8x32xf32>
      %111 = tpu.matmul %106, %110, %cst_61 {dimension_numbers = #tpu.dot_dimension_numbers<[1], [0], [0], [1], [0, 0, 1, 1], [], []>} : vector<8x32xbf16>, vector<32x32xbf16>, vector<8x32xf32> -> vector<8x32xf32>
      %112 = arith.truncf %111 : vector<8x32xf32> to vector<8x32xbf16>
      %113 = vector.shape_cast %109 : vector<8x32xbf16> to vector<8x4x8xbf16>
      %114 = tpu.transpose %113, [1, 0, 2] : vector<8x4x8xbf16> -> vector<4x8x8xbf16>
      %c0_62 = arith.constant 0 : index
      %c0_63 = arith.constant 0 : index
      %c0_64 = arith.constant 0 : index
      %115 = vector.load %arg17[%c0_62, %c0_63, %c0_64] : memref<4x8x8xbf16, #tpu.memory_space<vmem>>, vector<4x8x8xbf16>
      tpu.vector_store %arg17[%c0_62, %c0_63, %c0_64], %114 {strides = array<i32>} : memref<4x8x8xbf16, #tpu.memory_space<vmem>>, vector<4x8x8xbf16>,
      %116 = vector.shape_cast %112 : vector<8x32xbf16> to vector<8x4x8xbf16>
      %117 = tpu.transpose %116, [1, 0, 2] : vector<8x4x8xbf16> -> vector<4x8x8xbf16>
      %c0_65 = arith.constant 0 : index
      %c0_66 = arith.constant 0 : index
      %c0_67 = arith.constant 0 : index
      %118 = vector.load %arg18[%c0_65, %c0_66, %c0_67] : memref<4x8x8xbf16, #tpu.memory_space<vmem>>, vector<4x8x8xbf16>
      tpu.vector_store %arg18[%c0_65, %c0_66, %c0_67], %117 {strides = array<i32>} : memref<4x8x8xbf16, #tpu.memory_space<vmem>>, vector<4x8x8xbf16>,
    } else {
    }
    %5 = arith.truncf %1 : vector<8x32xf32> to vector<8x32xbf16>
    %c0_3 = arith.constant 0 : index
    %c0_4 = arith.constant 0 : index
    %6 = vector.load %arg4[%c0_3, %c0_4] : memref<32x32xbf16, #tpu.memory_space<vmem>>, vector<32x32xbf16>
    %cst = arith.constant dense<0.000000e+00> : vector<8x32xf32>
    %7 = tpu.matmul %5, %6, %cst {dimension_numbers = #tpu.dot_dimension_numbers<[1], [0], [0], [1], [0, 0, 1, 1], [], []>} : vector<8x32xbf16>, vector<32x32xbf16>, vector<8x32xf32> -> vector<8x32xf32>
    %8 = arith.truncf %7 : vector<8x32xf32> to vector<8x32xbf16>
    %9 = vector.shape_cast %8 : vector<8x32xbf16> to vector<8x4x8xbf16>
    %10 = tpu.transpose %9, [1, 0, 2] : vector<8x4x8xbf16> -> vector<4x8x8xbf16>
    %cst_5 = arith.constant 0xFF800000 : f32
    %11 = vector.broadcast %cst_5 : f32 to vector<4x8x1xf32>
    %cst_6 = arith.constant 0.000000e+00 : f32
    %12 = vector.broadcast %cst_6 : f32 to vector<4x8x1xf32>
    %cst_7 = arith.constant 0.000000e+00 : f32
    %13 = vector.broadcast %cst_7 : f32 to vector<4x8x8xf32>
    %c0_8 = arith.constant 0 : index
    %c0_9 = arith.constant 0 : index
    %c0_10 = arith.constant 0 : index
    %14 = vector.load %arg17[%c0_8, %c0_9, %c0_10] : memref<4x8x8xbf16, #tpu.memory_space<vmem>>, vector<4x8x8xbf16>
    %c0_11 = arith.constant 0 : index
    %c0_12 = arith.constant 0 : index
    %c0_13 = arith.constant 0 : index
    %15 = vector.load %arg18[%c0_11, %c0_12, %c0_13] : memref<4x8x8xbf16, #tpu.memory_space<vmem>>, vector<4x8x8xbf16>
    "tpu.trace_start"() <{level = 10 : i32, message = "hqd,hkd->hqk"}> : () -> ()
    %cst_14 = arith.constant dense<0.000000e+00> : vector<4x8x8xf32>
    %16 = tpu.matmul %10, %14, %cst_14 {dimension_numbers = #tpu.dot_dimension_numbers<[2], [2], [1], [1], [0, 0, 0, 1, 1, 1], [0], [0]>} : vector<4x8x8xbf16>, vector<4x8x8xbf16>, vector<4x8x8xf32> -> vector<4x8x8xf32>
    "tpu.trace_stop"() : () -> ()
    %cst_15 = arith.constant dense<0xFF800000> : vector<4x8xf32>
    %17 = vector.multi_reduction <maximumf>, %16, %cst_15 [2] : vector<4x8x8xf32> to vector<4x8xf32>
    %18 = vector.shape_cast %17 : vector<4x8xf32> to vector<4x8x1xf32>
    %19 = arith.maximumf %11, %18 : vector<4x8x1xf32>
    %20 = arith.subf %11, %19 : vector<4x8x1xf32>
    %21 = math.exp %20 : vector<4x8x1xf32>
    %22 = vector.broadcast %19 : vector<4x8x1xf32> to vector<4x8x8xf32>
    %23 = arith.subf %16, %22 : vector<4x8x8xf32>
    %24 = math.exp %23 : vector<4x8x8xf32>
    %25 = arith.mulf %21, %12 : vector<4x8x1xf32>
    %cst_16 = arith.constant dense<0.000000e+00> : vector<4x8xf32>
    %26 = vector.multi_reduction <add>, %24, %cst_16 [2] : vector<4x8x8xf32> to vector<4x8xf32>
    %27 = vector.shape_cast %26 : vector<4x8xf32> to vector<4x8x1xf32>
    %28 = arith.addf %25, %27 : vector<4x8x1xf32>
    %29 = vector.broadcast %21 : vector<4x8x1xf32> to vector<4x8x8xf32>
    %30 = arith.mulf %29, %13 : vector<4x8x8xf32>
    %31 = arith.truncf %24 : vector<4x8x8xf32> to vector<4x8x8xbf16>
    "tpu.trace_start"() <{level = 10 : i32, message = "hqk,hkd->hqd"}> : () -> ()
    %cst_17 = arith.constant dense<0.000000e+00> : vector<4x8x8xf32>
    %32 = tpu.matmul %31, %15, %cst_17 {dimension_numbers = #tpu.dot_dimension_numbers<[2], [1], [1], [2], [0, 0, 0, 1, 1, 2], [0], [0]>} : vector<4x8x8xbf16>, vector<4x8x8xbf16>, vector<4x8x8xf32> -> vector<4x8x8xf32>
    "tpu.trace_stop"() : () -> ()
    %33 = arith.addf %30, %32 : vector<4x8x8xf32>
    %34 = tpu.reciprocal %28 {approx = true} : vector<4x8x1xf32> -> vector<4x8x1xf32>
    %35 = vector.broadcast %34 : vector<4x8x1xf32> to vector<4x8x8xf32>
    %36 = arith.mulf %33, %35 : vector<4x8x8xf32>
    %37 = arith.truncf %36 : vector<4x8x8xf32> to vector<4x8x8xbf16>
    %38 = tpu.transpose %37, [1, 0, 2] : vector<4x8x8xbf16> -> vector<8x4x8xbf16>
    %39 = vector.shape_cast %38 : vector<8x4x8xbf16> to vector<8x32xbf16>
    %c0_18 = arith.constant 0 : index
    %c0_19 = arith.constant 0 : index
    %40 = vector.load %arg7[%c0_18, %c0_19] : memref<32x32xbf16, #tpu.memory_space<vmem>>, vector<32x32xbf16>
    %cst_20 = arith.constant dense<0.000000e+00> : vector<8x32xf32>
    %41 = tpu.matmul %39, %40, %cst_20 {dimension_numbers = #tpu.dot_dimension_numbers<[1], [0], [0], [1], [0, 0, 1, 1], [], []>} : vector<8x32xbf16>, vector<32x32xbf16>, vector<8x32xf32> -> vector<8x32xf32>
    %42 = arith.addf %41, %1 : vector<8x32xf32>
    %c0_21 = arith.constant 0 : index
    %c0_22 = arith.constant 0 : index
    %43 = vector.load %arg12[%c0_21, %c0_22] : memref<1x32xf32, #tpu.memory_space<vmem>>, vector<1x32xf32>
    %c0_23 = arith.constant 0 : index
    %c0_24 = arith.constant 0 : index
    %44 = vector.load %arg13[%c0_23, %c0_24] : memref<1x32xf32, #tpu.memory_space<vmem>>, vector<1x32xf32>
    %cst_25 = arith.constant dense<0.000000e+00> : vector<8xf32>
    %45 = vector.multi_reduction <add>, %42, %cst_25 [1] : vector<8x32xf32> to vector<8xf32>
    %46 = vector.shape_cast %45 : vector<8xf32> to vector<8x1xf32>
    %cst_26 = arith.constant 3.200000e+01 : f32
    %47 = vector.broadcast %cst_26 : f32 to vector<8x1xf32>
    %48 = arith.divf %46, %47 : vector<8x1xf32>
    %49 = vector.broadcast %48 : vector<8x1xf32> to vector<8x32xf32>
    %50 = arith.subf %42, %49 : vector<8x32xf32>
    %51 = arith.mulf %50, %50 : vector<8x32xf32>
    %cst_27 = arith.constant dense<0.000000e+00> : vector<8xf32>
    %52 = vector.multi_reduction <add>, %51, %cst_27 [1] : vector<8x32xf32> to vector<8xf32>
    %53 = vector.shape_cast %52 : vector<8xf32> to vector<8x1xf32>
    %cst_28 = arith.constant 3.200000e+01 : f32
    %54 = vector.broadcast %cst_28 : f32 to vector<8x1xf32>
    %55 = arith.divf %53, %54 : vector<8x1xf32>
    %cst_29 = arith.constant 9.99999974E-6 : f32
    %56 = vector.broadcast %cst_29 : f32 to vector<8x1xf32>
    %57 = arith.addf %55, %56 : vector<8x1xf32>
    %58 = math.rsqrt %57 : vector<8x1xf32>
    %59 = vector.broadcast %58 : vector<8x1xf32> to vector<8x32xf32>
    %60 = arith.mulf %50, %59 : vector<8x32xf32>
    %61 = vector.broadcast %43 : vector<1x32xf32> to vector<8x32xf32>
    %62 = arith.mulf %60, %61 : vector<8x32xf32>
    %63 = vector.broadcast %44 : vector<1x32xf32> to vector<8x32xf32>
    %64 = arith.addf %62, %63 : vector<8x32xf32>
    %65 = arith.truncf %64 : vector<8x32xf32> to vector<8x32xbf16>
    %c0_30 = arith.constant 0 : index
    %c0_31 = arith.constant 0 : index
    %66 = vector.load %arg8[%c0_30, %c0_31] : memref<32x64xbf16, #tpu.memory_space<vmem>>, vector<32x64xbf16>
    %cst_32 = arith.constant dense<0.000000e+00> : vector<8x64xf32>
    %67 = tpu.matmul %65, %66, %cst_32 {dimension_numbers = #tpu.dot_dimension_numbers<[1], [0], [0], [1], [0, 0, 1, 1], [], []>} : vector<8x32xbf16>, vector<32x64xbf16>, vector<8x64xf32> -> vector<8x64xf32>
    %c0_33 = arith.constant 0 : index
    %c0_34 = arith.constant 0 : index
    %68 = vector.load %arg9[%c0_33, %c0_34] : memref<1x64xf32, #tpu.memory_space<vmem>>, vector<1x64xf32>
    %69 = vector.broadcast %68 : vector<1x64xf32> to vector<8x64xf32>
    %70 = arith.addf %67, %69 : vector<8x64xf32>
    %cst_35 = arith.constant 0.000000e+00 : f32
    %71 = vector.broadcast %cst_35 : f32 to vector<8x64xf32>
    %72 = arith.maximumf %70, %71 : vector<8x64xf32>
    %73 = arith.truncf %72 : vector<8x64xf32> to vector<8x64xbf16>
    %c0_36 = arith.constant 0 : index
    %c0_37 = arith.constant 0 : index
    %74 = vector.load %arg10[%c0_36, %c0_37] : memref<64x32xbf16, #tpu.memory_space<vmem>>, vector<64x32xbf16>
    %cst_38 = arith.constant dense<0.000000e+00> : vector<8x32xf32>
    %75 = tpu.matmul %73, %74, %cst_38 {dimension_numbers = #tpu.dot_dimension_numbers<[1], [0], [0], [1], [0, 0, 1, 1], [], []>} : vector<8x64xbf16>, vector<64x32xbf16>, vector<8x32xf32> -> vector<8x32xf32>
    %c0_39 = arith.constant 0 : index
    %c0_40 = arith.constant 0 : index
    %76 = vector.load %arg11[%c0_39, %c0_40] : memref<1x32xf32, #tpu.memory_space<vmem>>, vector<1x32xf32>
    %77 = vector.broadcast %76 : vector<1x32xf32> to vector<8x32xf32>
    %78 = arith.addf %75, %77 : vector<8x32xf32>
    %79 = arith.addf %78, %64 : vector<8x32xf32>
    %c0_41 = arith.constant 0 : index
    %c0_42 = arith.constant 0 : index
    %80 = vector.load %arg14[%c0_41, %c0_42] : memref<1x32xf32, #tpu.memory_space<vmem>>, vector<1x32xf32>
    %c0_43 = arith.constant 0 : index
    %c0_44 = arith.constant 0 : index
    %81 = vector.load %arg15[%c0_43, %c0_44] : memref<1x32xf32, #tpu.memory_space<vmem>>, vector<1x32xf32>
    %cst_45 = arith.constant dense<0.000000e+00> : vector<8xf32>
    %82 = vector.multi_reduction <add>, %79, %cst_45 [1] : vector<8x32xf32> to vector<8xf32>
    %83 = vector.shape_cast %82 : vector<8xf32> to vector<8x1xf32>
    %cst_46 = arith.constant 3.200000e+01 : f32
    %84 = vector.broadcast %cst_46 : f32 to vector<8x1xf32>
    %85 = arith.divf %83, %84 : vector<8x1xf32>
    %86 = vector.broadcast %85 : vector<8x1xf32> to vector<8x32xf32>
    %87 = arith.subf %79, %86 : vector<8x32xf32>
    %88 = arith.mulf %87, %87 : vector<8x32xf32>
    %cst_47 = arith.constant dense<0.000000e+00> : vector<8xf32>
    %89 = vector.multi_reduction <add>, %88, %cst_47 [1] : vector<8x32xf32> to vector<8xf32>
    %90 = vector.shape_cast %89 : vector<8xf32> to vector<8x1xf32>
    %cst_48 = arith.constant 3.200000e+01 : f32
    %91 = vector.broadcast %cst_48 : f32 to vector<8x1xf32>
    %92 = arith.divf %90, %91 : vector<8x1xf32>
    %cst_49 = arith.constant 9.99999974E-6 : f32
    %93 = vector.broadcast %cst_49 : f32 to vector<8x1xf32>
    %94 = arith.addf %92, %93 : vector<8x1xf32>
    %95 = math.rsqrt %94 : vector<8x1xf32>
    %96 = vector.broadcast %95 : vector<8x1xf32> to vector<8x32xf32>
    %97 = arith.mulf %87, %96 : vector<8x32xf32>
    %98 = vector.broadcast %80 : vector<1x32xf32> to vector<8x32xf32>
    %99 = arith.mulf %97, %98 : vector<8x32xf32>
    %100 = vector.broadcast %81 : vector<1x32xf32> to vector<8x32xf32>
    %101 = arith.addf %99, %100 : vector<8x32xf32>
    %c0_50 = arith.constant 0 : index
    %c0_51 = arith.constant 0 : index
    %c0_52 = arith.constant 0 : index
    %102 = vector.load %arg16[%c0_50, %c0_51, %c0_52] : memref<1x8x32xf32, #tpu.memory_space<vmem>>, vector<1x8x32xf32>
    %103 = vector.shape_cast %102 : vector<1x8x32xf32> to vector<8x32xf32>
    %104 = vector.shape_cast %101 : vector<8x32xf32> to vector<1x8x32xf32>
    tpu.vector_store %arg16[%c0_50, %c0_51, %c0_52], %104 {strides = array<i32>} : memref<1x8x32xf32, #tpu.memory_space<vmem>>, vector<1x8x32xf32>,
    return
  }
  func.func @transform_0(%arg0: i32, %arg1: i32) -> (i32, i32, i32) {
    %c0_i32 = arith.constant 0 : i32
    %c0_i32_0 = arith.constant 0 : i32
    return %arg0, %arg1, %c0_i32 : i32, i32, i32
  }
  func.func @transform_1(%arg0: i32, %arg1: i32) -> (i32, i32, i32) {
    %c0_i32 = arith.constant 0 : i32
    %c0_i32_0 = arith.constant 0 : i32
    %c0_i32_1 = arith.constant 0 : i32
    return %arg0, %c0_i32, %c0_i32_0 : i32, i32, i32
  }
  func.func @transform_2(%arg0: i32, %arg1: i32) -> (i32, i32) {
    %c0_i32 = arith.constant 0 : i32
    %c0_i32_0 = arith.constant 0 : i32
    %c0_i32_1 = arith.constant 0 : i32
    return %c0_i32, %c0_i32_0 : i32, i32
  }
  func.func @transform_3(%arg0: i32, %arg1: i32) -> (i32, i32) {
    %c0_i32 = arith.constant 0 : i32
    %c0_i32_0 = arith.constant 0 : i32
    %c0_i32_1 = arith.constant 0 : i32
    return %c0_i32, %c0_i32_0 : i32, i32
  }
  func.func @transform_4(%arg0: i32, %arg1: i32) -> (i32, i32) {
    %c0_i32 = arith.constant 0 : i32
    %c0_i32_0 = arith.constant 0 : i32
    %c0_i32_1 = arith.constant 0 : i32
    return %c0_i32, %c0_i32_0 : i32, i32
  }
  func.func @transform_5(%arg0: i32, %arg1: i32) -> (i32, i32) {
    %c0_i32 = arith.constant 0 : i32
    %c0_i32_0 = arith.constant 0 : i32
    %c0_i32_1 = arith.constant 0 : i32
    return %c0_i32, %c0_i32_0 : i32, i32
  }
  func.func @transform_6(%arg0: i32, %arg1: i32) -> (i32, i32) {
    %c0_i32 = arith.constant 0 : i32
    %c0_i32_0 = arith.constant 0 : i32
    %c0_i32_1 = arith.constant 0 : i32
    return %c0_i32, %c0_i32_0 : i32, i32
  }
  func.func @transform_7(%arg0: i32, %arg1: i32) -> (i32, i32) {
    %c0_i32 = arith.constant 0 : i32
    %c0_i32_0 = arith.constant 0 : i32
    %c0_i32_1 = arith.constant 0 : i32
    return %c0_i32, %c0_i32_0 : i32, i32
  }
  func.func @transform_8(%arg0: i32, %arg1: i32) -> (i32, i32) {
    %c0_i32 = arith.constant 0 : i32
    %c0_i32_0 = arith.constant 0 : i32
    %c0_i32_1 = arith.constant 0 : i32
    return %c0_i32, %c0_i32_0 : i32, i32
  }
  func.func @transform_9(%arg0: i32, %arg1: i32) -> (i32, i32) {
    %c0_i32 = arith.constant 0 : i32
    %c0_i32_0 = arith.constant 0 : i32
    %c0_i32_1 = arith.constant 0 : i32
    return %c0_i32, %c0_i32_0 : i32, i32
  }
  func.func @transform_10(%arg0: i32, %arg1: i32) -> (i32, i32) {
    %c0_i32 = arith.constant 0 : i32
    %c0_i32_0 = arith.constant 0 : i32
    %c0_i32_1 = arith.constant 0 : i32
    return %c0_i32, %c0_i32_0 : i32, i32
  }
  func.func @transform_11(%arg0: i32, %arg1: i32) -> (i32, i32) {
    %c0_i32 = arith.constant 0 : i32
    %c0_i32_0 = arith.constant 0 : i32
    %c0_i32_1 = arith.constant 0 : i32
    return %c0_i32, %c0_i32_0 : i32, i32
  }
  func.func @transform_12(%arg0: i32, %arg1: i32) -> (i32, i32) {
    %c0_i32 = arith.constant 0 : i32
    %c0_i32_0 = arith.constant 0 : i32
    %c0_i32_1 = arith.constant 0 : i32
    return %c0_i32, %c0_i32_0 : i32, i32
  }
  func.func @transform_13(%arg0: i32, %arg1: i32) -> (i32, i32) {
    %c0_i32 = arith.constant 0 : i32
    %c0_i32_0 = arith.constant 0 : i32
    %c0_i32_1 = arith.constant 0 : i32
    return %c0_i32, %c0_i32_0 : i32, i32
  }
  func.func @transform_14(%arg0: i32, %arg1: i32) -> (i32, i32, i32) {
    %c0_i32 = arith.constant 0 : i32
    %c0_i32_0 = arith.constant 0 : i32
    return %arg0, %arg1, %c0_i32 : i32, i32, i32
  }
}

</mosaic_0001>

<bundles_post_ra>
// kernel: tpu_custom_call.1
= control target key start
LH: loop header
LB: loop body
LE: loop exit
PB: predicated region body
PF: predicated region fallthrough
CT: control target
= control target key end

     0   :  { %s4266_s0 = inlined_call_operand.hbm [shape: f32[2,8,32], index: 0, kind: input, shape index: {}]   ;;  %s4267_s1 = inlined_call_operand.hbm [shape: bf16[2,8,32], index: 1, kind: input, shape index: {}]   ;;  %s4268_s2 = inlined_call_operand.hbm [shape: bf16[32,32], index: 2, kind: input, shape index: {}]   ;;  %s4269_s3 = inlined_call_operand.hbm [shape: bf16[32,32], index: 3, kind: input, shape index: {}]   ;;  %s4270_s4 = inlined_call_operand.hbm [shape: bf16[32,32], index: 4, kind: input, shape index: {}]   ;;  %s4271_s5 = inlined_call_operand.hbm [shape: bf16[32,32], index: 5, kind: input, shape index: {}]   ;;  %s4272_s6 = inlined_call_operand.hbm [shape: bf16[32,64], index: 6, kind: input, shape index: {}]   ;;  %s4273_s7 = inlined_call_operand.hbm [shape: f32[1,64], index: 7, kind: input, shape index: {}]   ;;  %s4274_s8 = inlined_call_operand.hbm [shape: bf16[64,32], index: 8, kind: input, shape index: {}]   ;;  %s4275_s9 = inlined_call_operand.hbm [shape: f32[1,32], index: 9, kind: input, shape index: {}]   ;;  %s4276_s10 = inlined_call_operand.hbm [shape: f32[1,32], index: 10, kind: input, shape index: {}]   ;;  %s4277_s11 = inlined_call_operand.hbm [shape: f32[1,32], index: 11, kind: input, shape index: {}]   ;;  %s4278_s12 = inlined_call_operand.hbm [shape: f32[1,32], index: 12, kind: input, shape index: {}]   ;;  %s4279_s13 = inlined_call_operand.hbm [shape: f32[1,32], index: 13, kind: input, shape index: {}]   ;;  %s4280_s14 = inlined_call_operand.hbm [shape: f32[2,8,32], index: 14, kind: output, shape index: {}]  }
   0x1   :  { %4301 = sst [smem:[#allocation46_spill]] %s4266_s0 }
   0x2   :  { %4302 = sst [smem:[#allocation47_spill]] %s4267_s1 }
   0x3   :  { %4303 = sst [smem:[#allocation48_spill]] %s4269_s3 }
   0x4   :  { %4304 = sst [smem:[#allocation49_spill]] %s4280_s14 }
   0x5   :  { %19 = vsyncpa [#allocation5], 0 }
   0x6   :  { %21 = vsyncpa [#allocation5 + $0x1], 0 }
   0x7   :  { %22 = vsyncpa [#allocation8], 0 }
   0x8   :  { %23 = vsyncpa [#allocation11], 0 }
   0x9   :  { %24 = vsyncpa [#allocation14], 0 }
   0xa   :  { %25 = vsyncpa [#allocation17], 0 }
   0xb   :  { %26 = vsyncpa [#allocation20], 0 }
   0xc   :  { %27 = vsyncpa [#allocation23], 0 }
   0xd   :  { %28 = vsyncpa [#allocation26], 0 }
   0xe   :  { %29 = vsyncpa [#allocation6], 0 }
   0xf   :  { %31 = vsyncpa [#allocation6 + $0x1], 0  ;;  %s3576_s29 = smov 0   ;;  %s3578_s30 = smov 0  }
  0x10   :  { %s3580_s15 = smov 0   ;;  %s3582_s16 = smov 0  }
  0x11   :  { %s3584_s17 = smov 0   ;;  %s3586_s18 = smov 0  }
  0x12 LB: > { %4305 = sst [smem:[#allocation38_spill]] %s3451_s29  ;;  %s2509_s19 = sadd.s32 4294967295, %s3471_s18   ;;  %s3471_s18 = sphi %s3586_s18, %s37_s18   ;;  %s3467_s17 = sphi %s3584_s17, %s4347_s17   ;;  %s3463_s16 = sphi %s3582_s16, %s4346_s16   ;;  %s3459_s15 = sphi %s3580_s15, %s4345_s15   ;;  %s3455_s30 = sphi %s3578_s30, %s4344_s30   ;;  %s3451_s29 = sphi %s3576_s29, %s4343_s29  }
  0x13   : > { %4306 = sst [smem:[#allocation39_spill]] %s3463_s16  ;;  %s2510_s20 = sadd.s32 4294967294, %s3471_s18  }
  0x14   : > { %4307 = sst [smem:[#allocation40_spill]] %s3471_s18  ;;  %p71_p0 = scmp.ne.s32.totalorder %s3455_s30, %s3451_s29 }
  0x15   : > { %p3610_p1 = scmp.eq.s32.totalorder %s2509_s19, 0  ;;  %p3614_p2 = scmp.eq.s32.totalorder %s2509_s19, 1 }
  0x16   : > { %p381_p3 = scmp.eq.s32.totalorder %s2510_s20, 1  ;;  %p2511_p5 = scmp.ge.s32.totalorder %s3471_s18, 1 }
  0x17   : > { %s4308_s21 = scalar_select %p3610_p1, 1, 0 }
  0x18   : > { %s4310_s22 = scalar_select %p3614_p2, 1, 0 }
  0x19   : > { %4309 = sst [smem:[#allocation41_spill]] %s4308_s21  ;;  %p3620_p4 = por %p3610_p1, %p71_p0 }
  0x1a   : > { %4311 = sst [smem:[#allocation42_spill]] %s4310_s22  ;;  %p3625_p6 = por %p381_p3, %p71_p0 }
  0x1b   : > { %s4312_s23 = scalar_select %p3620_p4, 1, 0 }
  0x1c   : > { %s4314_s24 = scalar_select %p3625_p6, 1, 0 }
  0x1d   : > { %4313 = sst [smem:[#allocation43_spill]] %s4312_s23  ;;  %p388_p7 = scmp.lt.s32.totalorder %s3471_s18, 3 }
  0x1e   : > { %4315 = sst [smem:[#allocation44_spill]] %s4314_s24  ;;  %s2512_s25 = sshll.u32 %s3463_s16, 6 }
  0x1f   : > { %p3631_p8 = pnand %p2511_p5, %p388_p7  ;;  %s4318_s1 = sld [smem:[#allocation47_spill]] }
  0x20   : > { %s3473_s20 = smov [#allocation7]  }
  0x21   : > { %s4316_s26 = scalar_select %p3631_p8, 1, 0 }
  0x22   : > { %s403_s29 = sshll.u32 %s3473_s20, 4  ;;  %p2771_p9 = pneg %p3631_p8  ;;  %s404_s29 = int_to_ptr.vmem [resolvable:$true] %s403_s29 }
  0x23   : > { %4317 = sst [smem:[#allocation45_spill]] %s4316_s26 }
  0x24   : > { %p3645_p11 = pnand %p2771_p9, %p3620_p4  ;;  %p3651_p12 = pnand %p2771_p9, %p3610_p1 }
  0x25   : > { %s3638_s19 = scalar_lea.hbm %s4318_s1, %s2512_s25  ;;  %s2966_s14 = scalar_lea.hbm %s4318_s1, 128 }
  0x26   : > { %s4320_s25 = scalar_select %p3651_p12, 1, 0 }
  0x27   : > { %s2961_s27 = scalar_lea.hbm %s3638_s19, 64  ;;  %p2963_p0 = pneg %p3645_p11 }
  0x28   : > { %p2962_p13 = scmp.ne.s32.totalorder %s3638_s19, %s2961_s27  ;;  %p2967_p7 = scmp.lt.u32.totalorder %s3638_s19, %s4318_s1 }
  0x29   : > { %p2968_p9 = scmp.lt.u32.totalorder %s2966_s14, %s2961_s27  ;;  %p2970_p6 = scmp.lt.u32.totalorder %s2961_s27, %s3638_s19 }
  0x2a   : > { %p2964_p3 = pnand %p2963_p0, %p2962_p13 }
  0x2b   : > { %p2969_p10 = por %p2968_p9, %p2967_p7 }
  0x2c   : > { %p2965_p5 = pneg %p2964_p3 }
  0x2d   : > { %p2971_p1 = por %p2970_p6, %p2969_p10 }
  0x2f   : > { %p2972_p4 = pnand %p2971_p1, %p2965_p5 }
  0x31   : > { %2975 = shalt.err (!%p2972_p4)
}
  0x32   : > { %s2976_s23 = scalar_lea.vmem %s404_s29, 64  ;;  %p2984_p2 = scmp.lt.s32.totalorder %s404_s29, %s404_s29 }
  0x33   : > { %p2977_p8 = scmp.ne.s32.totalorder %s404_s29, %s2976_s23  ;;  %p2985_p12 = scmp.lt.s32.totalorder %s2976_s23, %s2976_s23 }
  0x35   : > { %p2979_p13 = pnand %p2977_p8, %p2963_p0  ;;  %p2986_p7 = por %p2985_p12, %p2984_p2 }
  0x37   : > { %p2980_p3 = pneg %p2979_p13 }
  0x39   : > { %p2987_p9 = pnand %p2986_p7, %p2980_p3 }
  0x3b   : > { %2990 = shalt.err (!%p2987_p9)
}
  0x3c   : > { %2774 = dma.hbm_to_vmem [thread:$0]  (!%p3645_p11), %s3638_s19, 64, %s404_s29, [#allocation8]  }
  0x3d   : > { %s3474_s14 = smov [#allocation10]   ;;  %s3475_s21 = smov [#allocation13]  }
  0x3e   : > { %s426_s16 = sshll.u32 %s3474_s14, 4  ;;  %s452_s27 = sshll.u32 %s3475_s21, 4  ;;  %s427_s16 = int_to_ptr.vmem [resolvable:$true] %s426_s16  ;;  %s453_s27 = int_to_ptr.vmem [resolvable:$true] %s452_s27 }
  0x3f   : > { %s4321_s3 = sld [smem:[#allocation48_spill]]  ;;  %p4322_p2 = scmp.ne.s32.totalorder %s4320_s25, 0 }
  0x41   : > { %p3684_p4 = pneg %p4322_p2 }
  0x45   : > { %s2991_s1 = scalar_lea.hbm %s4321_s3, 256 }
  0x46   : > { %p2992_p1 = scmp.ne.s32.totalorder %s4321_s3, %s2991_s1  ;;  %p2998_p10 = scmp.lt.u32.totalorder %s2991_s1, %s4321_s3 }
  0x48   : > { %p2994_p6 = pnand %p3684_p4, %p2992_p1 }
  0x4a   : > { %p2995_p8 = pneg %p2994_p6 }
  0x4c   : > { %p3000_p11 = pnand %p2998_p10, %p2995_p8 }
  0x4e   : > { %3003 = shalt.err (!%p3000_p11)
}
  0x4f   : > { %s3004_s19 = scalar_lea.vmem %s427_s16, 256  ;;  %p3012_p13 = scmp.lt.s32.totalorder %s427_s16, %s427_s16 }
  0x50   : > { %p3005_p12 = scmp.ne.s32.totalorder %s427_s16, %s3004_s19  ;;  %p3013_p3 = scmp.lt.s32.totalorder %s3004_s19, %s3004_s19 }
  0x52   : > { %p3007_p0 = pnand %p3005_p12, %p3684_p4  ;;  %p3014_p7 = por %p3013_p3, %p3012_p13 }
  0x54   : > { %p3008_p5 = pneg %p3007_p0 }
  0x56   : > { %p3015_p9 = pnand %p3014_p7, %p3008_p5 }
  0x58   : > { %3018 = shalt.err (!%p3015_p9)
}
  0x59   : > { %s3476_s0 = smov 64   ;;  %s3477_s26 = smov 4  }
  0x5a   : > { %2780 = dma.hbm_to_vmem [thread:$0]  (!%p4322_p2), %s4321_s3, 256, %s427_s16, [#allocation11], %s3476_s0, %s3476_s0, %s3477_s26  }
  0x5b   : > { %s3019_s20 = scalar_lea.hbm %s4271_s5, 256 }
  0x5c   : > { %p3020_p1 = scmp.ne.s32.totalorder %s4271_s5, %s3019_s20  ;;  %p3026_p10 = scmp.lt.u32.totalorder %s3019_s20, %s4271_s5 }
  0x5e   : > { %p3022_p6 = pnand %p3020_p1, %p3684_p4 }
  0x60   : > { %p3023_p8 = pneg %p3022_p6 }
  0x62   : > { %p3028_p11 = pnand %p3026_p10, %p3023_p8 }
  0x64   : > { %3031 = shalt.err (!%p3028_p11)
}
  0x65   : > { %s3032_s1 = scalar_lea.vmem %s453_s27, 256  ;;  %p3040_p13 = scmp.lt.s32.totalorder %s453_s27, %s453_s27 }
  0x66   : > { %p3033_p12 = scmp.ne.s32.totalorder %s453_s27, %s3032_s1  ;;  %p3041_p3 = scmp.lt.s32.totalorder %s3032_s1, %s3032_s1 }
  0x68   : > { %p3035_p0 = pnand %p3033_p12, %p3684_p4  ;;  %p3042_p7 = por %p3041_p3, %p3040_p13 }
  0x6a   : > { %p3036_p5 = pneg %p3035_p0 }
  0x6c   : > { %p3043_p9 = pnand %p3042_p7, %p3036_p5 }
  0x6e   : > { %3046 = shalt.err (!%p3043_p9)
}
  0x6f   : > { %2786 = dma.hbm_to_vmem [thread:$0]  (!%p4322_p2), %s4271_s5, 256, %s453_s27, [#allocation14], %s3476_s0, %s3476_s0, %s3477_s26  }
  0x70   : > { %s3478_s14 = smov [#allocation16]   ;;  %s3479_s28 = smov [#allocation19]  }
  0x71   : > { %s479_s21 = sshll.u32 %s3478_s14, 4  ;;  %s503_s20 = sshll.u32 %s3479_s28, 4  ;;  %s480_s21 = int_to_ptr.vmem [resolvable:$true] %s479_s21  ;;  %s504_s20 = int_to_ptr.vmem [resolvable:$true] %s503_s20 }
  0x72   : > { %s3047_s19 = scalar_lea.hbm %s4273_s7, 16 }
  0x73   : > { %p3048_p1 = scmp.ne.s32.totalorder %s4273_s7, %s3047_s19  ;;  %p3054_p10 = scmp.lt.u32.totalorder %s3047_s19, %s4273_s7 }
  0x75   : > { %p3050_p6 = pnand %p3048_p1, %p3684_p4 }
  0x77   : > { %p3051_p8 = pneg %p3050_p6 }
  0x79   : > { %p3056_p11 = pnand %p3054_p10, %p3051_p8 }
  0x7b   : > { %3059 = shalt.err (!%p3056_p11)
}
  0x7c   : > { %s3060_s27 = scalar_lea.vmem %s480_s21, 16  ;;  %s3067_s16 = scalar_lea.vmem %s480_s21, 32 }
  0x7d   : > { %p3061_p12 = scmp.ne.s32.totalorder %s480_s21, %s3060_s27  ;;  %p3068_p13 = scmp.lt.s32.totalorder %s480_s21, %s480_s21 }
  0x7e   : > { %p3069_p3 = scmp.lt.s32.totalorder %s3067_s16, %s3060_s27 }
  0x7f   : > { %p3063_p0 = pnand %p3061_p12, %p3684_p4 }
  0x80   : > { %p3070_p7 = por %p3069_p3, %p3068_p13 }
  0x81   : > { %p3064_p5 = pneg %p3063_p0 }
  0x83   : > { %p3071_p9 = pnand %p3070_p7, %p3064_p5 }
  0x85   : > { %3074 = shalt.err (!%p3071_p9)
}
  0x86   : > { %2792 = dma.hbm_to_vmem [thread:$0]  (!%p4322_p2), %s4273_s7, 16, %s480_s21, [#allocation17]  }
  0x87   : > { %s3075_s29 = scalar_lea.hbm %s4275_s9, 16 }
  0x88   : > { %p3076_p1 = scmp.ne.s32.totalorder %s4275_s9, %s3075_s29  ;;  %p3082_p10 = scmp.lt.u32.totalorder %s3075_s29, %s4275_s9 }
  0x8a   : > { %p3078_p6 = pnand %p3076_p1, %p3684_p4 }
  0x8c   : > { %p3079_p8 = pneg %p3078_p6 }
  0x8e   : > { %p3084_p11 = pnand %p3082_p10, %p3079_p8 }
  0x90   : > { %3087 = shalt.err (!%p3084_p11)
}
  0x91   : > { %s3088_s27 = scalar_lea.vmem %s504_s20, 16  ;;  %s3095_s21 = scalar_lea.vmem %s504_s20, 32 }
  0x92   : > { %p3089_p12 = scmp.ne.s32.totalorder %s504_s20, %s3088_s27  ;;  %p3096_p13 = scmp.lt.s32.totalorder %s504_s20, %s504_s20 }
  0x93   : > { %p3097_p3 = scmp.lt.s32.totalorder %s3095_s21, %s3088_s27 }
  0x94   : > { %p3091_p0 = pnand %p3089_p12, %p3684_p4 }
  0x95   : > { %p3098_p7 = por %p3097_p3, %p3096_p13 }
  0x96   : > { %p3092_p5 = pneg %p3091_p0 }
  0x98   : > { %p3099_p9 = pnand %p3098_p7, %p3092_p5 }
  0x9a   : > { %3102 = shalt.err (!%p3099_p9)
}
  0x9b   : > { %2798 = dma.hbm_to_vmem [thread:$0]  (!%p4322_p2), %s4275_s9, 16, %s504_s20, [#allocation20]  }
  0x9c   : > { %s3480_s14 = smov [#allocation22]   ;;  %s3481_s28 = smov [#allocation9]  }
  0x9d   : > { %s525_s18 = sshll.u32 %s3480_s14, 4  ;;  %s413_s29 = sshll.u32 %s3481_s28, 4  ;;  %s526_s18 = int_to_ptr.vmem [resolvable:$true] %s525_s18  ;;  %s414_s29 = int_to_ptr.vmem [resolvable:$true] %s413_s29 }
  0x9e   : > { %s3103_s1 = scalar_lea.hbm %s4277_s11, 16 }
  0x9f   : > { %p3104_p1 = scmp.ne.s32.totalorder %s4277_s11, %s3103_s1  ;;  %p3110_p10 = scmp.lt.u32.totalorder %s3103_s1, %s4277_s11 }
  0xa1   : > { %p3106_p6 = pnand %p3104_p1, %p3684_p4 }
  0xa3   : > { %p3107_p8 = pneg %p3106_p6 }
  0xa5   : > { %p3112_p11 = pnand %p3110_p10, %p3107_p8 }
  0xa7   : > { %3115 = shalt.err (!%p3112_p11)
}
  0xa8   : > { %s3116_s20 = scalar_lea.vmem %s526_s18, 16  ;;  %s3123_s3 = scalar_lea.vmem %s526_s18, 32 }
  0xa9   : > { %p3117_p12 = scmp.ne.s32.totalorder %s526_s18, %s3116_s20  ;;  %p3124_p13 = scmp.lt.s32.totalorder %s526_s18, %s526_s18 }
  0xaa   : > { %p3125_p3 = scmp.lt.s32.totalorder %s3123_s3, %s3116_s20 }
  0xab   : > { %p3119_p0 = pnand %p3117_p12, %p3684_p4 }
  0xac   : > { %p3126_p7 = por %p3125_p3, %p3124_p13 }
  0xad   : > { %p3120_p5 = pneg %p3119_p0 }
  0xaf   : > { %p3127_p9 = pnand %p3126_p7, %p3120_p5 }
  0xb1   : > { %3130 = shalt.err (!%p3127_p9)
}
  0xb2   : > { %2804 = dma.hbm_to_vmem [thread:$0]  (!%p4322_p2), %s4277_s11, 16, %s526_s18, [#allocation23]  }
  0xb3   : > { %s3131_s1 = scalar_lea.hbm %s4268_s2, 256 }
  0xb4   : > { %p3132_p1 = scmp.ne.s32.totalorder %s4268_s2, %s3131_s1  ;;  %p3138_p10 = scmp.lt.u32.totalorder %s3131_s1, %s4268_s2 }
  0xb6   : > { %p3134_p6 = pnand %p3132_p1, %p3684_p4 }
  0xb8   : > { %p3135_p8 = pneg %p3134_p6 }
  0xba   : > { %p3140_p11 = pnand %p3138_p10, %p3135_p8 }
  0xbc   : > { %3143 = shalt.err (!%p3140_p11)
}
  0xbd   : > { %s3144_s20 = scalar_lea.vmem %s414_s29, 256  ;;  %p3152_p13 = scmp.lt.s32.totalorder %s414_s29, %s414_s29 }
  0xbe   : > { %p3145_p12 = scmp.ne.s32.totalorder %s414_s29, %s3144_s20  ;;  %p3153_p3 = scmp.lt.s32.totalorder %s3144_s20, %s3144_s20 }
  0xc0   : > { %p3147_p0 = pnand %p3145_p12, %p3684_p4  ;;  %p3154_p7 = por %p3153_p3, %p3152_p13 }
  0xc2   : > { %p3148_p5 = pneg %p3147_p0 }
  0xc4   : > { %p3155_p9 = pnand %p3154_p7, %p3148_p5 }
  0xc6   : > { %3158 = shalt.err (!%p3155_p9)
}
  0xc7   : > { %2777 = dma.hbm_to_vmem [thread:$0]  (!%p4322_p2), %s4268_s2, 256, %s414_s29, [#allocation8], %s3476_s0, %s3476_s0, %s3477_s26  }
  0xc8   : > { %s3482_s14 = smov [#allocation12]   ;;  %s3483_s24 = smov [#allocation15]  }
  0xc9   : > { %s439_s28 = sshll.u32 %s3482_s14, 4  ;;  %s465_s19 = sshll.u32 %s3483_s24, 4  ;;  %s440_s28 = int_to_ptr.vmem [resolvable:$true] %s439_s28  ;;  %s466_s19 = int_to_ptr.vmem [resolvable:$true] %s465_s19 }
  0xca   : > { %s3159_s27 = scalar_lea.hbm %s4270_s4, 256 }
  0xcb   : > { %p3160_p1 = scmp.ne.s32.totalorder %s4270_s4, %s3159_s27  ;;  %p3166_p10 = scmp.lt.u32.totalorder %s3159_s27, %s4270_s4 }
  0xcd   : > { %p3162_p6 = pnand %p3160_p1, %p3684_p4 }
  0xcf   : > { %p3163_p8 = pneg %p3162_p6 }
  0xd1   : > { %p3168_p11 = pnand %p3166_p10, %p3163_p8 }
  0xd3   : > { %3171 = shalt.err (!%p3168_p11)
}
  0xd4   : > { %s3172_s29 = scalar_lea.vmem %s440_s28, 256  ;;  %p3180_p13 = scmp.lt.s32.totalorder %s440_s28, %s440_s28 }
  0xd5   : > { %p3173_p12 = scmp.ne.s32.totalorder %s440_s28, %s3172_s29  ;;  %p3181_p3 = scmp.lt.s32.totalorder %s3172_s29, %s3172_s29 }
  0xd7   : > { %p3175_p0 = pnand %p3173_p12, %p3684_p4  ;;  %p3182_p7 = por %p3181_p3, %p3180_p13 }
  0xd9   : > { %p3176_p5 = pneg %p3175_p0 }
  0xdb   : > { %p3183_p9 = pnand %p3182_p7, %p3176_p5 }
  0xdd   : > { %3186 = shalt.err (!%p3183_p9)
}
  0xde   : > { %2783 = dma.hbm_to_vmem [thread:$0]  (!%p4322_p2), %s4270_s4, 256, %s440_s28, [#allocation11], %s3476_s0, %s3476_s0, %s3477_s26  }
  0xdf   : > { %s3187_s22 = scalar_lea.hbm %s4272_s6, 256 }
  0xe0   : > { %p3188_p1 = scmp.ne.s32.totalorder %s4272_s6, %s3187_s22  ;;  %p3194_p10 = scmp.lt.u32.totalorder %s3187_s22, %s4272_s6 }
  0xe2   : > { %p3190_p6 = pnand %p3188_p1, %p3684_p4 }
  0xe4   : > { %p3191_p8 = pneg %p3190_p6 }
  0xe6   : > { %p3196_p11 = pnand %p3194_p10, %p3191_p8 }
  0xe8   : > { %3199 = shalt.err (!%p3196_p11)
}
  0xe9   : > { %s3200_s18 = scalar_lea.vmem %s466_s19, 256  ;;  %p3208_p13 = scmp.lt.s32.totalorder %s466_s19, %s466_s19 }
  0xea   : > { %p3201_p12 = scmp.ne.s32.totalorder %s466_s19, %s3200_s18  ;;  %p3209_p3 = scmp.lt.s32.totalorder %s3200_s18, %s3200_s18 }
  0xec   : > { %p3203_p0 = pnand %p3201_p12, %p3684_p4  ;;  %p3210_p7 = por %p3209_p3, %p3208_p13 }
  0xee   : > { %p3204_p5 = pneg %p3203_p0 }
  0xf0   : > { %p3211_p9 = pnand %p3210_p7, %p3204_p5 }
  0xf2   : > { %3214 = shalt.err (!%p3211_p9)
}
  0xf3   : > { %2789 = dma.hbm_to_vmem [thread:$0]  (!%p4322_p2), %s4272_s6, 256, %s466_s19, [#allocation14], %s3476_s0, %s3476_s0, %s3477_s26  }
  0xf4   : > { %s3484_s3 = smov [#allocation18]   ;;  %s3485_s24 = smov [#allocation21]  }
  0xf5   : > { %s489_s14 = sshll.u32 %s3484_s3, 4  ;;  %s514_s1 = sshll.u32 %s3485_s24, 4  ;;  %s490_s14 = int_to_ptr.vmem [resolvable:$true] %s489_s14  ;;  %s515_s1 = int_to_ptr.vmem [resolvable:$true] %s514_s1 }
  0xf6   : > { %s3215_s21 = scalar_lea.hbm %s4274_s8, 512 }
  0xf7   : > { %p3216_p1 = scmp.ne.s32.totalorder %s4274_s8, %s3215_s21  ;;  %p3222_p10 = scmp.lt.u32.totalorder %s3215_s21, %s4274_s8 }
  0xf9   : > { %p3218_p6 = pnand %p3216_p1, %p3684_p4 }
  0xfb   : > { %p3219_p8 = pneg %p3218_p6 }
  0xfd   : > { %p3224_p11 = pnand %p3222_p10, %p3219_p8 }
  0xff   : > { %3227 = shalt.err (!%p3224_p11)
}
 0x100   : > { %s3228_s19 = scalar_lea.vmem %s490_s14, 512  ;;  %p3236_p13 = scmp.lt.s32.totalorder %s490_s14, %s490_s14 }
 0x101   : > { %p3229_p12 = scmp.ne.s32.totalorder %s490_s14, %s3228_s19  ;;  %p3237_p3 = scmp.lt.s32.totalorder %s3228_s19, %s3228_s19 }
 0x103   : > { %p3231_p0 = pnand %p3229_p12, %p3684_p4  ;;  %p3238_p7 = por %p3237_p3, %p3236_p13 }
 0x105   : > { %p3232_p5 = pneg %p3231_p0 }
 0x107   : > { %p3239_p9 = pnand %p3238_p7, %p3232_p5 }
 0x109   : > { %3242 = shalt.err (!%p3239_p9)
}
 0x10a   : > { %2795 = dma.hbm_to_vmem [thread:$0]  (!%p4322_p2), %s4274_s8, 512, %s490_s14, [#allocation17], %s3476_s0, %s3476_s0, %s3477_s26  }
 0x10b   : > { %s3243_s27 = scalar_lea.hbm %s4276_s10, 16 }
 0x10c   : > { %p3244_p1 = scmp.ne.s32.totalorder %s4276_s10, %s3243_s27  ;;  %p3250_p10 = scmp.lt.u32.totalorder %s3243_s27, %s4276_s10 }
 0x10e   : > { %p3246_p6 = pnand %p3244_p1, %p3684_p4 }
 0x110   : > { %p3247_p8 = pneg %p3246_p6 }
 0x112   : > { %p3252_p11 = pnand %p3250_p10, %p3247_p8 }
 0x114   : > { %3255 = shalt.err (!%p3252_p11)
}
 0x115   : > { %s3256_s28 = scalar_lea.vmem %s515_s1, 16  ;;  %s3263_s0 = scalar_lea.vmem %s515_s1, 32 }
 0x116   : > { %p3257_p12 = scmp.ne.s32.totalorder %s515_s1, %s3256_s28  ;;  %p3264_p13 = scmp.lt.s32.totalorder %s515_s1, %s515_s1 }
 0x117   : > { %p3265_p3 = scmp.lt.s32.totalorder %s3263_s0, %s3256_s28 }
 0x118   : > { %p3259_p0 = pnand %p3257_p12, %p3684_p4 }
 0x119   : > { %p3266_p7 = por %p3265_p3, %p3264_p13 }
 0x11a   : > { %p3260_p5 = pneg %p3259_p0 }
 0x11c   : > { %p3267_p9 = pnand %p3266_p7, %p3260_p5 }
 0x11e   : > { %3270 = shalt.err (!%p3267_p9)
}
 0x11f   : > { %2801 = dma.hbm_to_vmem [thread:$0]  (!%p4322_p2), %s4276_s10, 16, %s515_s1, [#allocation20]  }
 0x120   : > { %s3486_s19 = smov [#allocation24]   ;;  %s3487_s3 = smov [#allocation25]  }
 0x121   : > { %s536_s29 = sshll.u32 %s3486_s19, 4  ;;  %s547_s24 = sshll.u32 %s3487_s3, 4  ;;  %s537_s29 = int_to_ptr.vmem [resolvable:$true] %s536_s29  ;;  %s548_s24 = int_to_ptr.vmem [resolvable:$true] %s547_s24 }
 0x122   : > { %s3271_s21 = scalar_lea.hbm %s4278_s12, 16 }
 0x123   : > { %p3272_p1 = scmp.ne.s32.totalorder %s4278_s12, %s3271_s21  ;;  %p3278_p10 = scmp.lt.u32.totalorder %s3271_s21, %s4278_s12 }
 0x125   : > { %p3274_p6 = pnand %p3272_p1, %p3684_p4 }
 0x127   : > { %p3275_p8 = pneg %p3274_p6 }
 0x129   : > { %p3280_p11 = pnand %p3278_p10, %p3275_p8 }
 0x12b   : > { %3283 = shalt.err (!%p3280_p11)
}
 0x12c   : > { %s3284_s1 = scalar_lea.vmem %s537_s29, 16  ;;  %s3291_s0 = scalar_lea.vmem %s537_s29, 32 }
 0x12d   : > { %p3285_p12 = scmp.ne.s32.totalorder %s537_s29, %s3284_s1  ;;  %p3292_p13 = scmp.lt.s32.totalorder %s537_s29, %s537_s29 }
 0x12e   : > { %p3293_p3 = scmp.lt.s32.totalorder %s3291_s0, %s3284_s1 }
 0x12f   : > { %p3287_p0 = pnand %p3285_p12, %p3684_p4 }
 0x130   : > { %p3294_p7 = por %p3293_p3, %p3292_p13 }
 0x131   : > { %p3288_p5 = pneg %p3287_p0 }
 0x133   : > { %p3295_p9 = pnand %p3294_p7, %p3288_p5 }
 0x135   : > { %3298 = shalt.err (!%p3295_p9)
}
 0x136   : > { %2807 = dma.hbm_to_vmem [thread:$0]  (!%p4322_p2), %s4278_s12, 16, %s537_s29, [#allocation23]  }
 0x137   : > { %s3299_s22 = scalar_lea.hbm %s4279_s13, 16 }
 0x138   : > { %p3300_p1 = scmp.ne.s32.totalorder %s4279_s13, %s3299_s22  ;;  %p3306_p10 = scmp.lt.u32.totalorder %s3299_s22, %s4279_s13 }
 0x13a   : > { %p3302_p6 = pnand %p3300_p1, %p3684_p4 }
 0x13c   : > { %p3303_p8 = pneg %p3302_p6 }
 0x13e   : > { %p3308_p11 = pnand %p3306_p10, %p3303_p8 }
 0x140   : > { %3311 = shalt.err (!%p3308_p11)
}
 0x141   : > { %s3312_s18 = scalar_lea.vmem %s548_s24, 16  ;;  %s3319_s29 = scalar_lea.vmem %s548_s24, 32 }
 0x142   : > { %p3313_p12 = scmp.ne.s32.totalorder %s548_s24, %s3312_s18  ;;  %p3320_p13 = scmp.lt.s32.totalorder %s548_s24, %s548_s24 }
 0x143   : > { %p3321_p3 = scmp.lt.s32.totalorder %s3319_s29, %s3312_s18 }
 0x144   : > { %p3315_p0 = pnand %p3313_p12, %p3684_p4 }
 0x145   : > { %p3322_p7 = por %p3321_p3, %p3320_p13 }
 0x146   : > { %p3316_p5 = pneg %p3315_p0 }
 0x148   : > { %p3323_p9 = pnand %p3322_p7, %p3316_p5 }
 0x14a   : > { %3326 = shalt.err (!%p3323_p9)
}
 0x14b   : > { %s4324_s0 = sld [smem:[#allocation40_spill]]  ;;  %s4325_s26 = sld [smem:[#allocation42_spill]] }
 0x14c   : > { %2810 = dma.hbm_to_vmem [thread:$0]  (!%p4322_p2), %s4279_s13, 16, %s548_s24, [#allocation26]  }
 0x14d   : > { %s58_s23 = sadd.s32 1, %s3459_s15  ;;  %s49_s14 = sadd.s32 1, %s3467_s17 }
 0x14e   : > { %p65_p4 = scmp.ne.s32.totalorder %s3459_s15, %s3455_s30  ;;  %p51_p1 = scmp.ge.s32.totalorder %s49_s14, 2 }
 0x14f   : > { %s558_s19 = sand.u32 1, %s3459_s15   ;;  %s2527_s22 = sshll.u32 %s3467_s17, 7 }
 0x150   : > { %s4349_s14 = smov (%p51_p1, %s49_s14), 0  ;;  %s2526_s24 = sshll.u32 %s558_s19, 3 }
 0x151   : > { %p66_p6 = scmp.eq.s32.totalorder %s4324_s0, 0  ;;  %p4326_p8 = scmp.ne.s32.totalorder %s4325_s26, 0 }
 0x152   : > { %p2831_p11 = scmp.lt.s32.totalorder %s4324_s0, 2  ;;  %s53_s3 = ssub.s32 %s3467_s17, %s4349_s14 }
 0x153   : > { %p3923_p10 = por %p4326_p8, %p65_p4  ;;  %p67_p12 = por %p66_p6, %p65_p4 }
 0x154   : > { %p56_p0 = scmp.eq.s32.totalorder %s53_s3, 0  ;;  %s4328_s20 = sld [smem:[#allocation46_spill]] }
 0x155   : > { %s562_s29 = scalar_lea.vmem [#allocation4], %s2526_s24  ;;  %p3946_p2 = pnand %p2831_p11, %p67_p12 }
 0x156   : > { %s3935_s27 = scalar_select %p56_p0, %s3459_s15, %s58_s23  }
 0x157   : > { %s570_s28 = sshll.u32 %s562_s29, 4  ;;  %s559_s26 = scalar_lea.sflag [#allocation5], %s558_s19  ;;  %s3942_s28 = int_to_ptr.vmem [resolvable:$true] %s570_s28 }
 0x158   : > { %p3329_p13 = pneg %p3946_p2 }
 0x15a   : > { %s3940_s18 = scalar_lea.hbm %s4328_s20, %s2527_s22  ;;  %s3332_s22 = scalar_lea.hbm %s4328_s20, 256 }
 0x15b   : > { %s3327_s23 = scalar_lea.hbm %s3940_s18, 128  ;;  %p3333_p9 = scmp.lt.u32.totalorder %s3940_s18, %s4328_s20 }
 0x15c   : > { %p3328_p5 = scmp.ne.s32.totalorder %s3940_s18, %s3327_s23  ;;  %p3334_p4 = scmp.lt.u32.totalorder %s3332_s22, %s3327_s23 }
 0x15d   : > { %p3336_p6 = scmp.lt.u32.totalorder %s3327_s23, %s3940_s18 }
 0x15e   : > { %p3330_p3 = pnand %p3329_p13, %p3328_p5  ;;  %p3335_p1 = por %p3334_p4, %p3333_p9 }
 0x160   : > { %p3331_p7 = pneg %p3330_p3  ;;  %p3337_p8 = por %p3336_p6, %p3335_p1 }
 0x162   : > { %p3338_p11 = pnand %p3337_p8, %p3331_p7 }
 0x164   : > { %3341 = shalt.err (!%p3338_p11)
}
 0x165   : > { %s3342_s19 = scalar_lea.vmem %s3942_s28, 128  ;;  %s3488_s16 = smov [#allocation4]  }
 0x166   : > { %p3343_p12 = scmp.ne.s32.totalorder %s3942_s28, %s3342_s19  ;;  %s3347_s29 = sshll.u32 %s3488_s16, 4  ;;  %s3348_s29 = int_to_ptr.vmem [resolvable:$false] %s3347_s29 }
 0x167   : > { %s3349_s3 = scalar_lea.vmem %s3348_s29, 256  ;;  %p3350_p3 = scmp.lt.s32.totalorder %s3942_s28, %s3348_s29 }
 0x168   : > { %p3345_p0 = pnand %p3343_p12, %p3329_p13  ;;  %p3351_p9 = scmp.lt.s32.totalorder %s3349_s3, %s3342_s19 }
 0x16a   : > { %p3346_p5 = pneg %p3345_p0  ;;  %p3352_p4 = por %p3351_p9, %p3350_p3 }
 0x16c   : > { %p3353_p1 = pnand %p3352_p4, %p3346_p5 }
 0x16e   : > { %3356 = shalt.err (!%p3353_p1)
}
 0x16f   : > { %2814 = dma.hbm_to_vmem [thread:$0]  (!%p3946_p2), %s3940_s18, 128, %s3942_s28, %s559_s26  }
 0x170   : > { %s4330_s23 = sld [smem:[#allocation45_spill]] }
 0x176   : > { %p4331_p7 = scmp.ne.s32.totalorder %s4330_s23, 0 }
 0x177   : > { %s4332_s24 = sld [smem:[#allocation43_spill]] (!%p4331_p7)  ;;  %s3978_s22 = sand.u32 (!%p4331_p7), 1, %s3455_s30  }
 0x178   : > { %579 = sbr.rel (%p4331_p7) target bundleno = 2824 (0xb08), region = 76  ;;  %s2529_s0 = sshll.u32 (!%p4331_p7), %s3978_s22, 3 }
 0x179   : > { %s582_s21 = scalar_lea.sflag (!%p4331_p7), [#allocation5], %s3978_s22  ;;  %s3984_s19 = scalar_lea.vmem (!%p4331_p7), [#allocation4], %s2529_s0 }
 0x17d   : > { %p4333_p13 = scmp.ne.s32.totalorder (!%p4331_p7), %s4332_s24, 0 }
 0x17f   : > { %3410 = dma.done.wait (%p4333_p13), %s582_s21, 128  }
 0x180   : > { %3412 = vsyncadd (%p4333_p13), %s582_s21, 4294967168 }
 0x181   : > { %3414 = dma.done.wait (%p4333_p13), [#allocation8], 64  }
 0x182   : > { %3416 = vsyncadd (%p4333_p13), [#allocation8], 4294967232  ;;  %s4334_s18 = sld [smem:[#allocation41_spill]] }
 0x188   : > { %p4335_p2 = scmp.ne.s32.totalorder %s4334_s18, 0 }
 0x18a   : > { %3418 = dma.done.wait (%p4335_p2), [#allocation8], 256  }
 0x18b   : > { %3420 = vsyncadd (%p4335_p2), [#allocation8], 4294967040 }
 0x18c   : > { %3422 = dma.done.wait (%p4335_p2), [#allocation11], 512  }
 0x18d   : > { %3424 = vsyncadd (%p4335_p2), [#allocation11], 4294966784 }
 0x18e   : > { %3426 = dma.done.wait (%p4335_p2), [#allocation14], 512  }
 0x18f   : > { %3428 = vsyncadd (%p4335_p2), [#allocation14], 4294966784 }
 0x190   : > { %3430 = dma.done.wait (%p4335_p2), [#allocation17], 528  }
 0x191   : > { %3432 = vsyncadd (%p4335_p2), [#allocation17], 4294966768 }
 0x192   : > { %3434 = dma.done.wait (%p4335_p2), [#allocation20], 32  }
 0x193   : > { %3436 = vsyncadd (%p4335_p2), [#allocation20], 4294967264 }
 0x194   : > { %3438 = dma.done.wait (%p4335_p2), [#allocation23], 32  }
 0x195   : > { %3440 = vsyncadd (%p4335_p2), [#allocation23], 4294967264 }
 0x196   : > { %3442 = dma.done.wait (%p4335_p2), [#allocation26], 16  }
 0x197   : > { %3444 = vsyncadd (%p4335_p2), [#allocation26], 4294967280  ;;  %v3489_v0 = vmov 0.0   ;;  %vm3490_vm0 = vmmov 0   ;;  %v2919_v1 = vld [vmem:[#allocation10] sm:$0xff]   ;;  %v2920_v2 = vld [vmem:[#allocation10 + $0x8] sm:$0xff]   ;;  %v817_v27 = vlaneseq }
 0x198   : > { %2617 = vmatprep.subr.bf16.mxu0 %v3489_v0  ;;  %2621 = vmatprep.mubr.msk.bf16.mxu0 %vm3490_vm0, %v3489_v0  ;;  %v688_v3 = vld [vmem:[#allocation7] sm:$0xf]  ;;  %v2921_v4 = vld [vmem:[#allocation9] sm:$0xff]   ;;  %vm705_vm1 = vcmask 261120   ;;  %v2922_v6 = vld [vmem:[#allocation9 + $0x8] sm:$0xff]   ;;  %s3491_s28 = smov 104  }
 0x199   : > { %2625 = vmatprep.subr.bf16.mxu1 %v3489_v0  ;;  %2629 = vmatprep.mubr.msk.bf16.mxu1 %vm3490_vm0, %v3489_v0  ;;  %v2923_v5 = vld [vmem:[#allocation12] sm:$0xff]   ;;  %v4031_v7 = vld [vmem:[%s3984_s19] sm:$0xff]  ;;  %s3492_s1 = smov 120   ;;  %s3493_s26 = smov 112   ;;  %v3494_v25 = vmov 1983009808  }
 0x19a   : > { %2618 = vmatpush3.bf16.msra.mxu0 %v2919_v1  ;;  %2626 = vmatpush3.bf16.msra.mxu1 %v2923_v5  ;;  %v1160_v8 = vpack.c.bf16 %v4031_v7, %v4031_v7  ;;  %v2924_v9 = vld [vmem:[#allocation12 + $0x8] sm:$0xff]   ;;  %v815_v26 = vunpack.c.l.s4 %v3494_v25  ;;  %v3495_v28 = vmov 1934713408   ;;  %v818_v31 = vshrl.u32 %v817_v27, 7  ;;  %s3497_s16 = smov 8   ;;  %s3498_s29 = smov 16  }
 0x19b   : > { %2619 = vmatprep.subr.bf16.mxu0 %v3489_v0  ;;  %2627 = vmatprep.subr.bf16.mxu1 %v3489_v0  ;;  %v832_v29 = vunpack.c.l.s4 %v3495_v28  ;;  %v3496_v46 = vmov 0   ;;  %vm979_vm2 = vcmask 60416   ;;  %vm1398_vm3 = vcmask 64512   ;;  %s3499_s3 = smov 24   ;;  %s4336_s23 = sld [smem:[#allocation39_spill]] }
 0x19c   : > { %v816_v30 = vunpack.c.0.s8 %v815_v26  ;;  %vm1646_vm4 = vcmask 1043456   ;;  %vm2011_vm5 = vcmask 130048   ;;  %vm2014_vm6 = vcmask 195584   ;;  %s681_s21 = scalar_lea.vmem [#allocation27], %s2529_s0  ;;  %s3500_s0 = smov [#allocation27]  }
 0x19d   : > { %v833_v32 = vunpack.c.0.s8 %v832_v29  ;;  %vm2213_vm7 = vcmask 523264   ;;  %s2303_s19 = sshll.u32 %s681_s21, 4  ;;  %s4218_s19 = int_to_ptr.vmem [resolvable:$true] %s2303_s19 }
 0x19e   : > { %2620 = vmatpush3.bf16.msra.mxu0 %v2920_v2  ;;  %2628 = vmatpush3.bf16.msra.mxu1 %v2924_v9  ;;  %v4053_v33 = vsub.s32 %v816_v30, %v818_v31 }
 0x19f   : > { %2633 = vmatprep.subr.bf16.mxu0 %v3489_v0  ;;  %2641 = vmatprep.subr.bf16.mxu1 %v3489_v0  ;;  %v4056_v37 = vsub.s32 %v833_v32, %v818_v31 }
 0x1a1   : > { %2622 = vmatmul.mubr.msk.bf16.vlgmr.msra.gmra.mrb[0].mxu0 %vm705_vm1, %v688_v3  ;;  %2630 = vmatmul.mubr.msk.bf16.vlgmr.msra.gmra.mrb[0].mxu1 %vm705_vm1, %v688_v3  ;;  %s2578_s24 = sshll.u32 %s4336_s23, 7 }
 0x1a2   : > { %2634 = vmatpush3.bf16.msra.mxu0 %v2921_v4  ;;  %2637 = vmatprep.mubr.msk.bf16.mxu0 %vm3490_vm0, %v3489_v0 }
 0x1a3   : > { %2635 = vmatprep.subr.bf16.mxu0 %v3489_v0  ;;  %2643 = vmatprep.mubr.msk.bf16.mxu1 %vm3490_vm0, %v3489_v0 }
 0x1a6   : > { %2636 = vmatpush3.bf16.msra.mxu0 %v2922_v6 }
 0x1a7   : > { %2647 = vmatprep.subr.bf16.mxu0 %v3489_v0 }
 0x1a9   : > { %2638 = vmatmul.mubr.msk.bf16.vlgmr.msra.gmra.mrb[4].mxu0 %vm705_vm1, %v1160_v8 }
 0x1aa   : > { %2649 = vmatprep.mubr.msk.bf16.mxu0 %vm3490_vm0, %v3489_v0 }
 0x274   : > { %v743_v10 = vpop.f32.mrb[0].mxu0  ;;  %v800_v20 = vpop.f32.mrb[0].mxu1 }
 0x275   : > { %v749_v11 = vpack.c.bf16 %v743_v10, %v743_v10  ;;  %v2623_v12 = vpop.f32.mrb[1].mxu0  ;;  %v4048_v21 = vpack.c.bf16 %v800_v20, %v800_v20  ;;  %v2631_v22 = vpop.f32.mrb[1].mxu1 }
 0x276   : > { %v746_v13 = vpop.f32.mrb[2].mxu0  ;;  %v803_v23 = vpop.f32.mrb[2].mxu1 }
 0x277   : > { %812 = vrot.lane.b32.xlu1 %v749_v11, %s3491_s28  ;;  %808 = vrot.lane.b32.xlu0 %v749_v11, %s3492_s1  ;;  %v2624_v14 = vpop.f32.mrb[3].mxu0  ;;  %v2632_v24 = vpop.f32.mrb[3].mxu1  ;;  %v820_v45 = vrot.slane %v749_v11, %v4053_v33 }
 0x27b   : > { %810 = vrot.lane.b32.xlu0 %v749_v11, %s3493_s26 }
 0x27c   : > { %v1215_v15 = vpop.f32.mrb[4].mxu0 }
 0x27d   : > { %v1221_v16 = vpack.c.bf16 %v1215_v15, %v1215_v15  ;;  %v2639_v17 = vpop.f32.mrb[5].mxu0 }
 0x27e   : > { %v1218_v18 = vpop.f32.mrb[6].mxu0 }
 0x27f   : > { %1225 = vrot.lane.b32.xlu0 %v1221_v16, %s3493_s26  ;;  %1223 = vrot.lane.b32.xlu1 %v1221_v16, %s3492_s1  ;;  %v2640_v19 = vpop.f32.mrb[7].mxu0  ;;  %v1235_v52 = vrot.slane %v1221_v16, %v4053_v33 }
 0x283   : > { %1227 = vrot.lane.b32.xlu1 %v1221_v16, %s3491_s28  ;;  %985 = vrot.lane.b32.xlu0 %v4048_v21, %s3492_s1  ;;  %s4337_s1 = sld [smem:[#allocation49_spill]] }
 0x287   : > { %987 = vrot.lane.b32.xlu1 %v4048_v21, %s3493_s26  ;;  %989 = vrot.lane.b32.xlu0 %v4048_v21, %s3491_s28 }
 0x289   : > { %s4216_s26 = scalar_lea.hbm %s4337_s1, %s2578_s24 }
 0x2e9   : > { %v813_v34 = vpop.permute.xlu1 %812  ;;  %v809_v35 = vpop.permute.xlu0 %808 }
 0x2ea   : > { %v862_v36 = vrot.slane %v813_v34, %v4053_v33  ;;  %v854_v38 = vrot.slane %v809_v35, %v4053_v33 }
 0x2ec   : > { %v863_v39 = vcombine.low %v854_v38, %v862_v36  ;;  %v864_v40 = vcombine.high %v854_v38, %v862_v36 }
 0x2ed   : > { %v811_v41 = vpop.permute.xlu0 %810 }
 0x2ee   : > { %v871_v42 = vrot.slane %v863_v39, %v4056_v37  ;;  %v878_v43 = vrot.slane %v864_v40, %v4056_v37  ;;  %v828_v44 = vrot.slane %v811_v41, %v4053_v33 }
 0x2f0   : > { %v879_v47 = vcombine.high %v871_v42, %v3496_v46  ;;  %v829_v48 = vcombine.low %v820_v45, %v828_v44  ;;  %v830_v49 = vcombine.high %v820_v45, %v828_v44  ;;  %v880_v51 = vcombine.high %v878_v43, %v3496_v46 }
 0x2f1   : > { %v1226_v50 = vpop.permute.xlu0 %1225  ;;  %v1224_v54 = vpop.permute.xlu1 %1223  ;;  %v886_v55 = vshrl.u32 %v871_v42, 16  ;;  %v902_v59 = vshrl.u32 %v878_v43, 16 }
 0x2f2   : > { %v1243_v53 = vrot.slane %v1226_v50, %v4053_v33  ;;  %v837_v56 = vrot.slane %v829_v48, %v4056_v37  ;;  %v844_v57 = vrot.slane %v830_v49, %v4056_v37  ;;  %v894_v58 = vshrl.u32 %v879_v47, 16 }
 0x2f3   : > { %v910_v3 = vshrl.u32 %v880_v51, 16  ;;  %v1269_v19 = vrot.slane %v1224_v54, %v4053_v33 }
 0x2f4   : > { %v1244_v60 = vcombine.low %v1235_v52, %v1243_v53  ;;  %v1245_v61 = vcombine.high %v1235_v52, %v1243_v53  ;;  %v845_v62 = vcombine.high %v837_v56, %v3496_v46  ;;  %v846_v63 = vcombine.high %v844_v57, %v3496_v46 }
 0x2f5   : > { %v883_v1 = vpack.i.b16 %v871_v42, %v837_v56  ;;  %v885_v2 = vshrl.u32 %v837_v56, 16  ;;  %v899_v4 = vpack.i.b16 %v878_v43, %v844_v57  ;;  %v901_v5 = vshrl.u32 %v844_v57, 16  ;;  %v1228_v16 = vpop.permute.xlu1 %1227 }
 0x2f6   : > { %v1252_v6 = vrot.slane %v1244_v60, %v4056_v37  ;;  %v891_v9 = vpack.i.b16 %v879_v47, %v845_v62  ;;  %v893_v10 = vshrl.u32 %v845_v62, 16  ;;  %v907_v11 = vpack.i.b16 %v880_v51, %v846_v63 }
 0x2f7   : > { %v887_v8 = vpack.i.b16 %v886_v55, %v885_v2  ;;  %v903_v12 = vpack.i.b16 %v902_v59, %v901_v5  ;;  %v909_v13 = vshrl.u32 %v846_v63, 16  ;;  %v913_v14 = vcombine.low %v883_v1, %v899_v4 }
 0x2f8   : > { %v1259_v15 = vrot.slane %v1245_v61, %v4056_v37  ;;  %v895_v17 = vpack.i.b16 %v894_v58, %v893_v10  ;;  %v921_v18 = vcombine.low %v891_v9, %v907_v11  ;;  %v1277_v25 = vrot.slane %v1228_v16, %v4053_v33 }
 0x2f9   : > { %v911_v20 = vpack.i.b16 %v910_v3, %v909_v13  ;;  %v938_v22 = vcombine.low %v887_v8, %v903_v12  ;;  %v920_v23 = vrot.slane %v913_v14, %v4053_v33  ;;  %v1260_v27 = vcombine.high %v1252_v6, %v3496_v46 }
 0x2fa   : > { %v928_v24 = vrot.slane %v921_v18, %v4053_v33  ;;  %v1261_v28 = vcombine.high %v1259_v15, %v3496_v46  ;;  %v1278_v30 = vcombine.low %v1269_v19, %v1277_v25  ;;  %v1279_v31 = vcombine.high %v1269_v19, %v1277_v25 }
 0x2fb   : > { %v946_v26 = vcombine.low %v895_v17, %v911_v20  ;;  %v945_v32 = vrot.slane %v938_v22, %v4053_v33  ;;  %v1300_v36 = vshrl.u32 %v1252_v6, 16  ;;  %v1308_v41 = vshrl.u32 %v1260_v27, 16 }
 0x2fc   : > { %v929_v29 = vcombine.low %v920_v23, %v928_v24  ;;  %v1286_v38 = vrot.slane %v1278_v30, %v4056_v37  ;;  %v1293_v39 = vrot.slane %v1279_v31, %v4056_v37  ;;  %v1316_v42 = vshrl.u32 %v1259_v15, 16 }
 0x2fd   : > { %v953_v34 = vrot.slane %v946_v26, %v4053_v33  ;;  %v1324_v43 = vshrl.u32 %v1261_v28, 16 }
 0x2fe   : > { %v936_v35 = vrot.slane %v929_v29, %v4056_v37  ;;  %v1294_v47 = vcombine.high %v1286_v38, %v3496_v46  ;;  %v1295_v48 = vcombine.high %v1293_v39, %v3496_v46  ;;  %v1298_v50 = vpack.i.b16 %v1286_v38, %v1252_v6 }
 0x2ff   : > { %v954_v40 = vcombine.low %v945_v32, %v953_v34  ;;  %v1301_v51 = vshrl.u32 %v1286_v38, 16  ;;  %v1314_v52 = vpack.i.b16 %v1293_v39, %v1259_v15  ;;  %v1317_v56 = vshrl.u32 %v1293_v39, 16 }
 0x300   : > { %v937_v44 = vcombine.high %v936_v35, %v3496_v46  ;;  %v967_v45 = vshrl.u32 %v936_v35, 16  ;;  %v1306_v54 = vpack.i.b16 %v1294_v47, %v1260_v27  ;;  %v1309_v55 = vshrl.u32 %v1294_v47, 16 }
 0x301   : > { %v961_v49 = vrot.slane %v954_v40, %v4056_v37  ;;  %v1302_v60 = vpack.i.b16 %v1301_v51, %v1300_v36  ;;  %v1318_v62 = vpack.i.b16 %v1317_v56, %v1316_v42  ;;  %v1322_v63 = vpack.i.b16 %v1295_v48, %v1261_v28  ;;  %v986_v42 = vpop.permute.xlu0 %985 }
 0x302   : > { %v975_v53 = vshrl.u32 %v937_v44, 16  ;;  %v1310_v61 = vpack.i.b16 %v1309_v55, %v1308_v41  ;;  %v1325_v1 = vshrl.u32 %v1295_v48, 16  ;;  %v1328_v5 = vcombine.low %v1298_v50, %v1314_v52 }
 0x303   : > { %v962_v57 = vcombine.high %v961_v49, %v3496_v46  ;;  %v965_v58 = vpack.i.b16 %v961_v49, %v936_v35  ;;  %v968_v59 = vshrl.u32 %v961_v49, 16  ;;  %v1336_v8 = vcombine.low %v1306_v54, %v1322_v63 }
 0x304   : > { %v1326_v6 = vpack.i.b16 %v1325_v1, %v1324_v43  ;;  %v1353_v9 = vcombine.low %v1302_v60, %v1318_v62  ;;  %v1335_v13 = vrot.slane %v1328_v5, %v4053_v33  ;;  %v997_v41 = vrot.slane %v4048_v21, %v4053_v33  ;;  %v988_v43 = vpop.permute.xlu1 %987 }
 0x305   : > { %v969_v2 = vpack.i.b16 %v968_v59, %v967_v45  ;;  %v973_v3 = vpack.i.b16 %v962_v57, %v937_v44  ;;  %v976_v4 = vshrl.u32 %v962_v57, 16  ;;  %980 = vst.msk [vmem:[#allocation2] sm:$0xf] %vm979_vm2, %v965_v58  ;;  %v1343_v11 = vrot.slane %v1336_v8, %v4053_v33  ;;  %v990_v49 = vpop.permute.xlu0 %989 }
 0x306   : > { %v1361_v12 = vcombine.low %v1310_v61, %v1326_v6  ;;  %v1360_v14 = vrot.slane %v1353_v9, %v4053_v33  ;;  %v1005_v44 = vrot.slane %v988_v43, %v4053_v33  ;;  %v1031_v45 = vrot.slane %v986_v42, %v4053_v33 }
 0x307   : > { %v977_v10 = vpack.i.b16 %v976_v4, %v975_v53  ;;  %981 = vst.msk [vmem:[#allocation2 + $0x4] sm:$0xf] %vm979_vm2, %v969_v2  ;;  %982 = vst.msk [vmem:[#allocation2 + $0x8] sm:$0xf] %vm979_vm2, %v973_v3  ;;  %v1344_v16 = vcombine.low %v1335_v13, %v1343_v11  ;;  %v1039_v50 = vrot.slane %v990_v49, %v4053_v33 }
 0x308   : > { %v1368_v15 = vrot.slane %v1361_v12, %v4053_v33  ;;  %v1006_v47 = vcombine.low %v997_v41, %v1005_v44  ;;  %v1007_v48 = vcombine.high %v997_v41, %v1005_v44 }
 0x309   : > { %983 = vst.msk [vmem:[#allocation2 + $0xc] sm:$0xf] %vm979_vm2, %v977_v10  ;;  %v1351_v24 = vrot.slane %v1344_v16, %v4056_v37  ;;  %v1040_v53 = vcombine.low %v1031_v45, %v1039_v50  ;;  %v1041_v54 = vcombine.high %v1031_v45, %v1039_v50 }
 0x30a   : > { %v1369_v17 = vcombine.low %v1360_v14, %v1368_v15  ;;  %v1014_v51 = vrot.slane %v1006_v47, %v4056_v37  ;;  %v1021_v52 = vrot.slane %v1007_v48, %v4056_v37 }
 0x30b   : > { %v1381_v28 = vshrl.u32 %v1351_v24, 16  ;;  %v1352_v35 = vcombine.high %v1351_v24, %v3496_v46  ;;  %v1048_v56 = vrot.slane %v1040_v53, %v4056_v37  ;;  %v1055_v57 = vrot.slane %v1041_v54, %v4056_v37 }
 0x30c   : > { %v1390_v18 = vld [vmem:[#allocation2] sm:$0xf]  ;;  %v1376_v22 = vrot.slane %v1369_v17, %v4056_v37  ;;  %v1022_v55 = vcombine.high %v1014_v51, %v3496_v46  ;;  %v1023_v21 = vcombine.high %v1021_v52, %v3496_v46  ;;  %v1062_v58 = vshrl.u32 %v1014_v51, 16 }
 0x30d   : > { %v1403_v19 = vsel %vm1398_vm3, %v1390_v18, 0  ;;  %v1387_v39 = vshrl.u32 %v1352_v35, 16  ;;  %v1078_v60 = vshrl.u32 %v1021_v52, 16  ;;  %v1056_v62 = vcombine.high %v1048_v56, %v3496_v46 }
 0x30e   : > { %2642 = vmatpush3.bf16.xpose.msra.mxu1 %v1403_v19  ;;  %v1391_v20 = vld [vmem:[#allocation2 + $0x4] sm:$0xf]  ;;  %v1382_v25 = vshrl.u32 %v1376_v22, 16  ;;  %v1392_v26 = vld [vmem:[#allocation2 + $0x8] sm:$0xf]  ;;  %v1380_v27 = vpack.i.b16 %v1376_v22, %v1351_v24  ;;  %v1377_v32 = vcombine.high %v1376_v22, %v3496_v46  ;;  %v1070_v59 = vshrl.u32 %v1022_v55, 16 }
 0x30f   : > { %v1449_v23 = vsel %vm1398_vm3, %v1391_v20, 0  ;;  %2653 = vmatprep.subr.bf16.mxu1 %v3489_v0  ;;  %v1495_v30 = vsel %vm1398_vm3, %v1392_v26, 0  ;;  %v1086_v61 = vshrl.u32 %v1023_v21, 16  ;;  %v1057_v63 = vcombine.high %v1055_v57, %v3496_v46 }
 0x310   : > { %2648 = vmatpush3.bf16.xpose.msra.mxu0 %v1449_v23  ;;  %v1393_v29 = vld [vmem:[#allocation2 + $0xc] sm:$0xf]  ;;  %v1383_v31 = vpack.i.b16 %v1382_v25, %v1381_v28  ;;  %v1388_v36 = vshrl.u32 %v1377_v32, 16  ;;  %v1386_v38 = vpack.i.b16 %v1377_v32, %v1352_v35  ;;  %v1063_v1 = vshrl.u32 %v1048_v56, 16 }
 0x311   : > { %2659 = vmatprep.subr.bf16.mxu0 %v3489_v0  ;;  %v1541_v34 = vsel %vm1398_vm3, %v1393_v29, 0  ;;  %v1079_v2 = vshrl.u32 %v1055_v57, 16  ;;  %v1060_v3 = vpack.i.b16 %v1048_v56, %v1014_v51  ;;  %v1076_v4 = vpack.i.b16 %v1055_v57, %v1021_v52 }
 0x312   : > { %v1389_v40 = vpack.i.b16 %v1388_v36, %v1387_v39  ;;  %v1071_v5 = vshrl.u32 %v1056_v62, 16  ;;  %v1087_v6 = vshrl.u32 %v1057_v63, 16  ;;  %v1064_v8 = vpack.i.b16 %v1063_v1, %v1062_v58 }
 0x313   : > { %v1068_v9 = vpack.i.b16 %v1056_v62, %v1022_v55  ;;  %v1080_v10 = vpack.i.b16 %v1079_v2, %v1078_v60  ;;  %v1084_v11 = vpack.i.b16 %v1057_v63, %v1023_v21  ;;  %v1090_v12 = vcombine.low %v1060_v3, %v1076_v4 }
 0x314   : > { %v1072_v13 = vpack.i.b16 %v1071_v5, %v1070_v59  ;;  %v1088_v14 = vpack.i.b16 %v1087_v6, %v1086_v61 }
 0x315   : > { %2644 = vmatmul.mubr.msk.bf16.vlgmr.msra.gmra.mrb[4].mxu1 %vm1398_vm3, %v1380_v27  ;;  %v1097_v15 = vrot.slane %v1090_v12, %v4053_v33  ;;  %v1098_v16 = vcombine.low %v1068_v9, %v1084_v11  ;;  %v1115_v17 = vcombine.low %v1064_v8, %v1080_v10 }
 0x316   : > { %2654 = vmatpush3.bf16.xpose.msra.mxu1 %v1495_v30  ;;  %2655 = vmatprep.mubr.msk.bf16.mxu1 %vm3490_vm0, %v3489_v0  ;;  %v1123_v18 = vcombine.low %v1072_v13, %v1088_v14 }
 0x317   : > { %2650 = vmatmul.mubr.msk.bf16.vlgmr.msra.gmra.mrb[8].mxu0 %vm1398_vm3, %v1383_v31  ;;  %2665 = vmatprep.subr.bf16.mxu1 %v3489_v0  ;;  %v1105_v19 = vrot.slane %v1098_v16, %v4053_v33  ;;  %v1122_v20 = vrot.slane %v1115_v17, %v4053_v33 }
 0x318   : > { %2660 = vmatpush3.bf16.xpose.msra.mxu0 %v1541_v34  ;;  %2661 = vmatprep.mubr.msk.bf16.mxu0 %vm3490_vm0, %v3489_v0  ;;  %v1130_v22 = vrot.slane %v1123_v18, %v4053_v33 }
 0x319   : > { %2671 = vmatprep.subr.bf16.mxu0 %v3489_v0  ;;  %v1106_v23 = vcombine.low %v1097_v15, %v1105_v19 }
 0x31a   : > { %v1131_v24 = vcombine.low %v1122_v20, %v1130_v22 }
 0x31b   : > { %v1113_v25 = vrot.slane %v1106_v23, %v4056_v37 }
 0x31c   : > { %v1138_v26 = vrot.slane %v1131_v24, %v4056_v37 }
 0x31d   : > { %2656 = vmatmul.mubr.msk.bf16.vlgmr.msra.gmra.mrb[8].mxu1 %vm1398_vm3, %v1386_v38  ;;  %v1114_v27 = vcombine.high %v1113_v25, %v3496_v46  ;;  %v1144_v28 = vshrl.u32 %v1113_v25, 16 }
 0x31e   : > { %2667 = vmatprep.mubr.msk.bf16.mxu1 %vm3490_vm0, %v3489_v0  ;;  %v1139_v29 = vcombine.high %v1138_v26, %v3496_v46  ;;  %v1142_v30 = vpack.i.b16 %v1138_v26, %v1113_v25  ;;  %v1145_v31 = vshrl.u32 %v1138_v26, 16 }
 0x31f   : > { %2662 = vmatmul.mubr.msk.bf16.vlgmr.msra.gmra.mrb[12].mxu0 %vm1398_vm3, %v1389_v40  ;;  %v1152_v32 = vshrl.u32 %v1114_v27, 16 }
 0x320   : > { %2673 = vmatprep.mubr.msk.bf16.mxu0 %vm3490_vm0, %v3489_v0  ;;  %v1146_v34 = vpack.i.b16 %v1145_v31, %v1144_v28  ;;  %v1150_v35 = vpack.i.b16 %v1139_v29, %v1114_v27  ;;  %v1153_v36 = vshrl.u32 %v1139_v29, 16  ;;  %1156 = vst.msk [vmem:[#allocation3] sm:$0xf] %vm979_vm2, %v1142_v30  ;;  %v2925_v30 = vld [vmem:[#allocation13] sm:$0xff]  }
 0x322   : > { %v1154_v38 = vpack.i.b16 %v1153_v36, %v1152_v32  ;;  %1157 = vst.msk [vmem:[#allocation3 + $0x4] sm:$0xf] %vm979_vm2, %v1146_v34  ;;  %1158 = vst.msk [vmem:[#allocation3 + $0x8] sm:$0xf] %vm979_vm2, %v1150_v35 }
 0x324   : > { %1159 = vst.msk [vmem:[#allocation3 + $0xc] sm:$0xf] %vm979_vm2, %v1154_v38 }
 0x327   : > { %v1394_v39 = vld [vmem:[#allocation3] sm:$0xf] }
 0x328   : > { %v1648_v40 = vsel %vm1646_vm4, %v1394_v39, 0 }
 0x329   : > { %2666 = vmatpush3.bf16.msra.mxu1 %v1648_v40  ;;  %v1395_v41 = vld [vmem:[#allocation3 + $0x4] sm:$0xf]  ;;  %v1396_v14 = vld [vmem:[#allocation3 + $0x8] sm:$0xf] }
 0x32a   : > { %v1694_v42 = vsel %vm1646_vm4, %v1395_v41, 0  ;;  %2677 = vmatprep.subr.bf16.mxu1 %v3489_v0  ;;  %v1740_v19 = vsel %vm1646_vm4, %v1396_v14, 0 }
 0x32b   : > { %2672 = vmatpush3.bf16.msra.mxu0 %v1694_v42  ;;  %v1397_v18 = vld [vmem:[#allocation3 + $0xc] sm:$0xf] }
 0x32c   : > { %2683 = vmatprep.subr.bf16.mxu0 %v3489_v0  ;;  %v1786_v23 = vsel %vm1646_vm4, %v1397_v18, 0 }
 0x3e8   : > { %v1439_v43 = vpop.f32.mrb[4].mxu1 }
 0x3e9   : > { %v2645_v44 = vpop.f32.mrb[5].mxu1  ;;  %v1583_v45 = vsel %vm1398_vm3, %v1439_v43, -inf }
 0x3ea   : > { %1584 = vmax.xlane.f32.xlu1 %v1583_v45  ;;  %v1442_v47 = vpop.f32.mrb[6].mxu1  ;;  %v1485_v48 = vpop.f32.mrb[8].mxu0 }
 0x3eb   : > { %v2646_v49 = vpop.f32.mrb[7].mxu1  ;;  %v2651_v50 = vpop.f32.mrb[9].mxu0  ;;  %v1586_v51 = vsel %vm1398_vm3, %v1485_v48, -inf }
 0x3ec   : > { %1587 = vmax.xlane.f32.xlu0 %v1586_v51  ;;  %v1488_v52 = vpop.f32.mrb[10].mxu0 }
 0x3ed   : > { %v2652_v53 = vpop.f32.mrb[11].mxu0 }
 0x3f0   : > { %v1531_v54 = vpop.f32.mrb[8].mxu1 }
 0x3f1   : > { %v2657_v55 = vpop.f32.mrb[9].mxu1  ;;  %v1589_v21 = vsel %vm1398_vm3, %v1531_v54, -inf }
 0x3f2   : > { %v1534_v56 = vpop.f32.mrb[10].mxu1  ;;  %1590 = vmax.xlane.f32.xlu0 %v1589_v21  ;;  %v1577_v57 = vpop.f32.mrb[12].mxu0 }
 0x3f3   : > { %v2658_v58 = vpop.f32.mrb[11].mxu1  ;;  %v2663_v59 = vpop.f32.mrb[13].mxu0  ;;  %v1592_v60 = vsel %vm1398_vm3, %v1577_v57, -inf }
 0x3f4   : > { %1593 = vmax.xlane.f32.xlu1 %v1592_v60  ;;  %v1580_v61 = vpop.f32.mrb[14].mxu0 }
 0x3f5   : > { %v2664_v62 = vpop.f32.mrb[15].mxu0 }
 0x477   : > { %v1585_v63 = vpop.xlane.xlu1 %1584 }
 0x478   : > { %v1607_v1 = vsub.f32 %v1439_v43, %v1585_v63  ;;  %v1595_v31 = vsub.f32 -inf, %v1585_v63 }
 0x479   : > { %v1588_v2 = vpop.xlane.xlu0 %1587 }
 0x47a   : > { %v1611_v3 = vmul.f32 1.442695, %v1607_v1  ;;  %v1608_v4 = vsub.f32 %v1485_v48, %v1588_v2  ;;  %v1596_v32 = vsub.f32 -inf, %v1588_v2  ;;  %v1599_v34 = vmul.f32 1.442695, %v1595_v31 }
 0x47c   : > { %v1613_v5 = vmul.f32 1.442695, %v1608_v4  ;;  %2933 = vpow2.f32 %v1611_v3  ;;  %v1601_v35 = vmul.f32 1.442695, %v1596_v32 }
 0x47e   : > { %2935 = vpow2.f32 %v1613_v5 }
 0x47f   : > { %v1591_v6 = vpop.xlane.xlu0 %1590 }
 0x480   : > { %v1609_v8 = vsub.f32 %v1531_v54, %v1591_v6  ;;  %v1597_v36 = vsub.f32 -inf, %v1591_v6 }
 0x481   : > { %v1594_v9 = vpop.xlane.xlu1 %1593 }
 0x482   : > { %v1615_v10 = vmul.f32 1.442695, %v1609_v8  ;;  %v1610_v11 = vsub.f32 %v1577_v57, %v1594_v9  ;;  %v1598_v38 = vsub.f32 -inf, %v1594_v9  ;;  %v1603_v39 = vmul.f32 1.442695, %v1597_v36 }
 0x484   : > { %v1617_v12 = vmul.f32 1.442695, %v1610_v11  ;;  %2937 = vpow2.f32 %v1615_v10  ;;  %v1605_v40 = vmul.f32 1.442695, %v1598_v38 }
 0x486   : > { %v2934_v13 = vpop.eup %2933  ;;  %2939 = vpow2.f32 %v1617_v12 }
 0x487   : > { %v1623_v15 = vsel %vm1398_vm3, %v2934_v13, 0.0  ;;  %v1639_v16 = vpack.c.bf16 %v2934_v13, %v2934_v13  ;;  %2941 = vpow2.f32 %v1599_v34 }
 0x488   : > { %v2936_v17 = vpop.eup %2935  ;;  %1624 = vadd.xlane.f32.xlu0 %v1623_v15  ;;  %2943 = vpow2.f32 %v1601_v35 }
 0x489   : > { %2668 = vmatmul.mubr.msk.bf16.vlgmr.msra.gmra.mrb[12].mxu1 %vm1398_vm3, %v1639_v16  ;;  %v1626_v20 = vsel %vm1398_vm3, %v2936_v17, 0.0  ;;  %v1640_v22 = vpack.c.bf16 %v2936_v17, %v2936_v17  ;;  %2945 = vpow2.f32 %v1603_v39 }
 0x48a   : > { %2678 = vmatpush3.bf16.msra.mxu1 %v1740_v19  ;;  %1627 = vadd.xlane.f32.xlu1 %v1626_v20  ;;  %2947 = vpow2.f32 %v1605_v40 }
 0x48b   : > { %2674 = vmatmul.mubr.msk.bf16.vlgmr.msra.gmra.mrb[16].mxu0 %vm1398_vm3, %v1640_v22  ;;  %2679 = vmatprep.mubr.msk.bf16.mxu1 %vm3490_vm0, %v3489_v0 }
 0x48c   : > { %2684 = vmatpush3.bf16.msra.mxu0 %v1786_v23  ;;  %2685 = vmatprep.mubr.msk.bf16.mxu0 %vm3490_vm0, %v3489_v0 }
 0x48d   : > { %2689 = vmatprep.subr.bf16.mxu1 %v3489_v0  ;;  %2697 = vmatprep.subr.bf16.mxu0 %v3489_v0 }
 0x48e   : > { %v2938_v24 = vpop.eup %2937 }
 0x48f   : > { %v1629_v25 = vsel %vm1398_vm3, %v2938_v24, 0.0  ;;  %v1641_v26 = vpack.c.bf16 %v2938_v24, %v2938_v24 }
 0x490   : > { %v2940_v27 = vpop.eup %2939  ;;  %1630 = vadd.xlane.f32.xlu0 %v1629_v25 }
 0x491   : > { %2680 = vmatmul.mubr.msk.bf16.vlgmr.msra.gmra.mrb[16].mxu1 %vm1398_vm3, %v1641_v26  ;;  %v1632_v28 = vsel %vm1398_vm3, %v2940_v27, 0.0  ;;  %v1642_v29 = vpack.c.bf16 %v2940_v27, %v2940_v27  ;;  %v2942_v41 = vpop.eup %2941 }
 0x492   : > { %1633 = vadd.xlane.f32.xlu1 %v1632_v28  ;;  %2693 = vmatprep.mubr.msk.bf16.mxu1 %vm3490_vm0, %v3489_v0  ;;  %v2944_v42 = vpop.eup %2943  ;;  %v1619_v44 = vmul.f32 0.0, %v2942_v41 }
 0x493   : > { %2686 = vmatmul.mubr.msk.bf16.vlgmr.msra.gmra.mrb[20].mxu0 %vm1398_vm3, %v1642_v29  ;;  %2690 = vmatpush3.bf16.msra.mxu1 %v2925_v30  ;;  %v1620_v48 = vmul.f32 0.0, %v2944_v42  ;;  %v2946_v50 = vpop.eup %2945 }
 0x494   : > { %2701 = vmatprep.mubr.msk.bf16.mxu0 %vm3490_vm0, %v3489_v0  ;;  %2691 = vmatprep.subr.bf16.mxu1 %v3489_v0  ;;  %v2948_v51 = vpop.eup %2947  ;;  %v1621_v53 = vmul.f32 0.0, %v2946_v50 }
 0x495   : > { %v1622_v21 = vmul.f32 0.0, %v2948_v51 }
 0x515   : > { %v1625_v43 = vpop.xlane.xlu0 %1624 }
 0x516   : > { %v1635_v47 = vadd.f32 %v1625_v43, %v1619_v44 }
 0x517   : > { %v1628_v45 = vpop.xlane.xlu1 %1627 }
 0x518   : > { %v1636_v49 = vadd.f32 %v1628_v45, %v1620_v48  ;;  %2949 = vrcp.f32 %v1635_v47 }
 0x51a   : > { %2951 = vrcp.f32 %v1636_v49 }
 0x51d   : > { %v1631_v52 = vpop.xlane.xlu0 %1630 }
 0x51e   : > { %v1637_v55 = vadd.f32 %v1631_v52, %v1621_v53 }
 0x51f   : > { %v1634_v54 = vpop.xlane.xlu1 %1633 }
 0x520   : > { %v1638_v56 = vadd.f32 %v1634_v54, %v1622_v21  ;;  %2953 = vrcp.f32 %v1637_v55 }
 0x522   : > { %v2950_v60 = vpop.eup %2949  ;;  %2955 = vrcp.f32 %v1638_v56 }
 0x524   : > { %v2952_v4 = vpop.eup %2951 }
 0x52a   : > { %v2954_v12 = vpop.eup %2953 }
 0x52c   : > { %v2956_v20 = vpop.eup %2955 }
 0x55c   : > { %v1684_v57 = vpop.f32.mrb[12].mxu1 }
 0x55d   : > { %v1828_v58 = vadd.f32 %v1684_v57, %v1619_v44  ;;  %v2669_v59 = vpop.f32.mrb[13].mxu1 }
 0x55e   : > { %v1687_v61 = vpop.f32.mrb[14].mxu1  ;;  %v1730_v62 = vpop.f32.mrb[16].mxu0 }
 0x55f   : > { %v1836_v63 = vmul.f32 %v2950_v60, %v1828_v58  ;;  %v1829_v1 = vadd.f32 %v1730_v62, %v1620_v48  ;;  %v2670_v2 = vpop.f32.mrb[15].mxu1  ;;  %v2675_v3 = vpop.f32.mrb[17].mxu0 }
 0x560   : > { %v1733_v5 = vpop.f32.mrb[18].mxu0 }
 0x561   : > { %v1837_v6 = vmul.f32 %v2952_v4, %v1829_v1  ;;  %v2676_v8 = vpop.f32.mrb[19].mxu0  ;;  %v1840_v15 = vpack.c.bf16 %v1836_v63, %v1836_v63  ;;  %v2926_v5 = vld [vmem:[#allocation13 + $0x8] sm:$0xff]  }
 0x562   : > { %2692 = vmatpush3.bf16.msra.mxu1 %v2926_v5 }
 0x563   : > { %v1874_v23 = vpack.c.bf16 %v1837_v6, %v1837_v6  ;;  %v1847_v27 = vrot.slane %v1840_v15, %v4053_v33  ;;  %2705 = vmatprep.subr.bf16.mxu1 %v3489_v0 }
 0x564   : > { %v1776_v9 = vpop.f32.mrb[16].mxu1 }
 0x565   : > { %v1830_v10 = vadd.f32 %v1776_v9, %v1621_v53  ;;  %v2681_v11 = vpop.f32.mrb[17].mxu1  ;;  %v1881_v30 = vrot.slane %v1874_v23, %v4053_v33 }
 0x566   : > { %v1779_v13 = vpop.f32.mrb[18].mxu1  ;;  %v1822_v14 = vpop.f32.mrb[20].mxu0 }
 0x567   : > { %v1838_v16 = vmul.f32 %v2954_v12, %v1830_v10  ;;  %v1831_v17 = vadd.f32 %v1822_v14, %v1622_v21  ;;  %v2682_v18 = vpop.f32.mrb[19].mxu1  ;;  %v2687_v19 = vpop.f32.mrb[21].mxu0 }
 0x568   : > { %v1825_v22 = vpop.f32.mrb[22].mxu0 }
 0x569   : > { %v1848_v24 = vpack.c.bf16 %v1838_v16, %v1838_v16  ;;  %v1839_v25 = vmul.f32 %v2956_v20, %v1831_v17  ;;  %v2688_v26 = vpop.f32.mrb[23].mxu0 }
 0x56b   : > { %v1855_v28 = vrot.slane %v1848_v24, %v4053_v33  ;;  %v1882_v29 = vpack.c.bf16 %v1839_v25, %v1839_v25 }
 0x56d   : > { %v1856_v31 = vcombine.low %v1847_v27, %v1855_v28  ;;  %v1857_v32 = vcombine.high %v1847_v27, %v1855_v28  ;;  %v1889_v34 = vrot.slane %v1882_v29, %v4053_v33 }
 0x56f   : > { %v1864_v35 = vrot.slane %v1856_v31, %v4056_v37  ;;  %v1871_v36 = vrot.slane %v1857_v32, %v4056_v37  ;;  %v1890_v38 = vcombine.low %v1881_v30, %v1889_v34  ;;  %v1891_v39 = vcombine.high %v1881_v30, %v1889_v34 }
 0x571   : > { %v1872_v40 = vcombine.high %v1864_v35, %v3496_v46  ;;  %v1898_v41 = vrot.slane %v1890_v38, %v4056_v37  ;;  %v1905_v42 = vrot.slane %v1891_v39, %v4056_v37  ;;  %v1873_v43 = vcombine.high %v1871_v36, %v3496_v46 }
 0x572   : > { %v1912_v44 = vshrl.u32 %v1864_v35, 16  ;;  %v1928_v51 = vshrl.u32 %v1871_v36, 16 }
 0x573   : > { %v1906_v45 = vcombine.high %v1898_v41, %v3496_v46  ;;  %v1907_v47 = vcombine.high %v1905_v42, %v3496_v46  ;;  %v1910_v48 = vpack.i.b16 %v1898_v41, %v1864_v35  ;;  %v1913_v49 = vshrl.u32 %v1898_v41, 16  ;;  %v2928_v41 = vld [vmem:[#allocation15 + $0x8] sm:$0xff]  }
 0x574   : > { %v1920_v50 = vshrl.u32 %v1872_v40, 16  ;;  %v1926_v52 = vpack.i.b16 %v1905_v42, %v1871_v36  ;;  %v1929_v53 = vshrl.u32 %v1905_v42, 16  ;;  %v1936_v57 = vshrl.u32 %v1873_v43, 16  ;;  %v2930_v42 = vld [vmem:[#allocation18 + $0x8] sm:$0xff]  }
 0x575   : > { %v1914_v54 = vpack.i.b16 %v1913_v49, %v1912_v44  ;;  %v1918_v55 = vpack.i.b16 %v1906_v45, %v1872_v40  ;;  %v1921_v21 = vshrl.u32 %v1906_v45, 16  ;;  %v1934_v56 = vpack.i.b16 %v1907_v47, %v1873_v43  ;;  %v2927_v40 = vld [vmem:[#allocation15] sm:$0xff]  }
 0x576   : > { %v1930_v58 = vpack.i.b16 %v1929_v53, %v1928_v51  ;;  %v1937_v59 = vshrl.u32 %v1907_v47, 16  ;;  %v1940_v60 = vcombine.low %v1910_v48, %v1926_v52  ;;  %2698 = vmatpush3.bf16.msra.mxu0 %v2927_v40  ;;  %v2563_v48 = vld [vmem:[#allocation21] ss:$0 sm:$0xff] }
 0x577   : > { %v1922_v61 = vpack.i.b16 %v1921_v21, %v1920_v50  ;;  %v1948_v62 = vcombine.low %v1918_v55, %v1934_v56  ;;  %2699 = vmatprep.subr.bf16.mxu0 %v3489_v0  ;;  %v2564_v50 = vld [vmem:[#allocation22] ss:$0 sm:$0xff]  ;;  %v2932_v55 = vld [vmem:[#allocation18 + $0x18] sm:$0xff]  }
 0x578   : > { %v1938_v63 = vpack.i.b16 %v1937_v59, %v1936_v57  ;;  %v1965_v1 = vcombine.low %v1914_v54, %v1930_v58  ;;  %v1947_v2 = vrot.slane %v1940_v60, %v4053_v33  ;;  %v2931_v54 = vld [vmem:[#allocation18 + $0x10] sm:$0xff]   ;;  %v2565_v21 = vld [vmem:[#allocation16] ss:$0 sm:$0xff] }
 0x579   : > { %v1955_v3 = vrot.slane %v1948_v62, %v4053_v33 }
 0x57a   : > { %v1973_v4 = vcombine.low %v1922_v61, %v1938_v63  ;;  %v1972_v8 = vrot.slane %v1965_v1, %v4053_v33  ;;  %2700 = vmatpush3.bf16.msra.mxu0 %v2928_v41  ;;  %v2569_v63 = vld [vmem:[#allocation19] ss:$0 sm:$0xff] }
 0x57b   : > { %v1956_v6 = vcombine.low %v1947_v2, %v1955_v3 }
 0x57c   : > { %v1980_v9 = vrot.slane %v1973_v4, %v4053_v33 }
 0x57d   : > { %v1963_v10 = vrot.slane %v1956_v6, %v4056_v37 }
 0x57e   : > { %v1981_v11 = vcombine.low %v1972_v8, %v1980_v9 }
 0x57f   : > { %v1964_v13 = vcombine.high %v1963_v10, %v3496_v46  ;;  %v1993_v14 = vshrl.u32 %v1963_v10, 16 }
 0x580   : > { %v1988_v12 = vrot.slane %v1981_v11, %v4056_v37 }
 0x581   : > { %v1999_v20 = vshrl.u32 %v1964_v13, 16 }
 0x582   : > { %v1994_v15 = vshrl.u32 %v1988_v12, 16  ;;  %v1989_v16 = vcombine.high %v1988_v12, %v3496_v46  ;;  %v1992_v17 = vpack.i.b16 %v1988_v12, %v1963_v10 }
 0x584   : > { %v1995_v18 = vpack.i.b16 %v1994_v15, %v1993_v14  ;;  %v1998_v19 = vpack.i.b16 %v1989_v16, %v1964_v13  ;;  %v2000_v22 = vshrl.u32 %v1989_v16, 16 }
 0x586   : > { %2002 = vrot.lane.b32.xlu0 %v1995_v18, %s3497_s16  ;;  %2004 = vrot.lane.b32.xlu1 %v1998_v19, %s3498_s29  ;;  %v2001_v33 = vpack.i.b16 %v2000_v22, %v1999_v20  ;;  %v2576_v19 = vld [vmem:[#allocation25] ss:$0 sm:$0xff]  ;;  %s2289_s16 = scalar_lea.sflag [#allocation6], %s3978_s22  ;;  %s3357_s29 = scalar_lea.vmem %s4218_s19, 128 }
 0x587   : > { %p3358_p6 = scmp.ne.s32.totalorder %s4218_s19, %s3357_s29 }
 0x589   : > { %p3359_p8 = pnand %p3358_p6, %p3923_p10 }
 0x58a   : > { %2006 = vrot.lane.b32.xlu1 %v2001_v33, %s3499_s3  ;;  %s3361_s3 = sshll.u32 %s3500_s0, 4  ;;  %s3362_s3 = int_to_ptr.vmem [resolvable:$false] %s3361_s3 }
 0x58b   : > { %p3360_p11 = pneg %p3359_p8  ;;  %s3363_s23 = scalar_lea.vmem %s3362_s3, 256 }
 0x58c   : > { %p3364_p12 = scmp.lt.s32.totalorder %s4218_s19, %s3362_s3  ;;  %p3365_p0 = scmp.lt.s32.totalorder %s3363_s23, %s3357_s29 }
 0x58e   : > { %p3366_p5 = por %p3365_p0, %p3364_p12 }
 0x590   : > { %p3367_p3 = pnand %p3366_p5, %p3360_p11 }
 0x5f8   : > { %v2003_v23 = vpop.permute.xlu0 %2002  ;;  %v2005_v37 = vpop.permute.xlu1 %2004 }
 0x5f9   : > { %v2010_v24 = vsel %vm1398_vm3, %v1992_v17, %v2003_v23  ;;  %v2575_v17 = vld [vmem:[#allocation24] ss:$0 sm:$0xff] }
 0x5fa   : > { %v2013_v25 = vsel %vm2011_vm5, %v2010_v24, %v2005_v37 }
 0x5fc   : > { %v2007_v46 = vpop.permute.xlu1 %2006 }
 0x5fd   : > { %v2016_v26 = vsel %vm2014_vm6, %v2013_v25, %v2007_v46 }
 0x5fe   : > { %2694 = vmatmul.mubr.msk.bf16.vlgmr.msra.gmra.mrb[20].mxu1 %vm705_vm1, %v2016_v26 }
 0x5ff   : > { %2713 = vmatprep.mubr.msk.bf16.mxu1 %vm3490_vm0, %v3489_v0 }
 0x6d1   : > { %v2069_v27 = vpop.f32.mrb[20].mxu1 }
 0x6d2   : > { %v2070_v28 = vadd.f32 %v2069_v27, %v4031_v7  ;;  %v2695_v29 = vpop.f32.mrb[21].mxu1  ;;  %v2929_v7 = vld [vmem:[#allocation18] sm:$0xff]  }
 0x6d3   : > { %v2072_v30 = vpop.f32.mrb[22].mxu1  ;;  %2706 = vmatpush3.bf16.msra.mxu1 %v2929_v7 }
 0x6d4   : > { %v2696_v31 = vpop.f32.mrb[23].mxu1  ;;  %v2077_v32 = vsel %vm705_vm1, %v2070_v28, 0.0  ;;  %2707 = vmatprep.subr.bf16.mxu1 %v3489_v0 }
 0x6d5   : > { %2078 = vadd.xlane.f32.xlu0 %v2077_v32 }
 0x6d7   : > { %2708 = vmatpush3.bf16.msra.mxu1 %v2930_v42 }
 0x6d8   : > { %2709 = vmatprep.subr.bf16.mxu1 %v3489_v0 }
 0x6db   : > { %2710 = vmatpush3.bf16.msra.mxu1 %v2931_v54 }
 0x6dc   : > { %2711 = vmatprep.subr.bf16.mxu1 %v3489_v0 }
 0x6df   : > { %2712 = vmatpush3.bf16.msra.mxu1 %v2932_v55 }
 0x762   : > { %v2079_v34 = vpop.xlane.xlu0 %2078 }
 0x763   : > { %v2081_v35 = vmul.f32 0.03125, %v2079_v34 }
 0x765   : > { %v2082_v36 = vsub.f32 %v2070_v28, %v2081_v35 }
 0x767   : > { %v2083_v38 = vmul.f32 %v2082_v36, %v2082_v36 }
 0x769   : > { %v2084_v39 = vsel %vm705_vm1, %v2083_v38, 0.0 }
 0x76a   : > { %2085 = vadd.xlane.f32.xlu1 %v2084_v39 }
 0x7f7   : > { %v2086_v43 = vpop.xlane.xlu1 %2085 }
 0x7f8   : > { %v2087_v44 = vmul.f32 0.03125, %v2086_v43 }
 0x7fa   : > { %v2088_v45 = vadd.f32 1e-05, %v2087_v44 }
 0x7fc   : > { %2957 = vrsqrt.f32 %v2088_v45 }
 0x806   : > { %v2958_v47 = vpop.eup %2957 }
 0x807   : > { %v2090_v49 = vmul.f32 %v2958_v47, %v2082_v36 }
 0x809   : > { %v2097_v51 = vmul.f32 %v2563_v48, %v2090_v49 }
 0x80b   : > { %v2104_v52 = vadd.f32 %v2564_v50, %v2097_v51 }
 0x80d   : > { %v2105_v53 = vpack.c.bf16 %v2104_v52, %v2104_v52 }
 0x80f   : > { %2702 = vmatmul.mubr.msk.bf16.vlgmr.msra.gmra.mrb[24].mxu0 %vm705_vm1, %v2105_v53 }
 0x8e2   : > { %v2166_v56 = vpop.f32.mrb[24].mxu0 }
 0x8e3   : > { %v2167_v57 = vadd.f32 %v2565_v21, %v2166_v56  ;;  %v2703_v58 = vpop.f32.mrb[25].mxu0 }
 0x8e4   : > { %v2169_v59 = vpop.f32.mrb[26].mxu0 }
 0x8e5   : > { %v2172_v60 = vmax.f32 %v2167_v57, 0.0  ;;  %v2704_v61 = vpop.f32.mrb[27].mxu0 }
 0x8e7   : > { %v2173_v62 = vpack.c.bf16 %v2172_v60, %v2172_v60 }
 0x8e9   : > { %2714 = vmatmul.mubr.msk.bf16.vlgmr.msra.gmra.mrb[24].mxu1 %vm2213_vm7, %v2173_v62 }
 0x9bc   : > { %v2251_v1 = vpop.f32.mrb[24].mxu1 }
 0x9bd   : > { %v2252_v2 = vadd.f32 %v2569_v63, %v2251_v1  ;;  %v2715_v3 = vpop.f32.mrb[25].mxu1 }
 0x9be   : > { %v2254_v4 = vpop.f32.mrb[26].mxu1 }
 0x9bf   : > { %v2716_v5 = vpop.f32.mrb[27].mxu1  ;;  %v2257_v6 = vadd.f32 %v2252_v2, %v2104_v52 }
 0x9c1   : > { %v2260_v0 = vsel %vm705_vm1, %v2257_v6, 0.0 }
 0x9c2   : > { %2261 = vadd.xlane.f32.xlu0 %v2260_v0 }
 0xa4f   : > { %v2262_v8 = vpop.xlane.xlu0 %2261 }
 0xa50   : > { %v2263_v9 = vmul.f32 0.03125, %v2262_v8 }
 0xa52   : > { %v2264_v10 = vsub.f32 %v2257_v6, %v2263_v9 }
 0xa54   : > { %v2265_v11 = vmul.f32 %v2264_v10, %v2264_v10 }
 0xa56   : > { %v2266_v12 = vsel %vm705_vm1, %v2265_v11, 0.0 }
 0xa57   : > { %2267 = vadd.xlane.f32.xlu0 %v2266_v12 }
 0xae4   : > { %v2268_v13 = vpop.xlane.xlu0 %2267 }
 0xae5   : > { %v2269_v14 = vmul.f32 0.03125, %v2268_v13 }
 0xae7   : > { %v2270_v15 = vadd.f32 1e-05, %v2269_v14 }
 0xae9   : > { %2959 = vrsqrt.f32 %v2270_v15 }
 0xaf3   : > { %v2960_v16 = vpop.eup %2959 }
 0xaf4   : > { %v2272_v18 = vmul.f32 %v2960_v16, %v2264_v10 }
 0xaf6   : > { %v2279_v20 = vmul.f32 %v2575_v17, %v2272_v18 }
 0xaf8   : > { %v2286_v22 = vadd.f32 %v2576_v19, %v2279_v20 }
 0xafa   : > { %2287 = vst.msk [vmem:[%s681_s21] sm:$0xff] %vm705_vm1, %v2286_v22 }
 0xafb   : > { %3370 = shalt.err (!%p3367_p3)
}
 0xafc   : > { %s3371_s22 = scalar_lea.hbm %s4216_s26, 128  ;;  %s3375_s18 = scalar_lea.hbm %s4337_s1, 256 }
 0xafd   : > { %p3372_p9 = scmp.ne.s32.totalorder %s4216_s26, %s3371_s22  ;;  %p3376_p7 = scmp.lt.u32.totalorder %s4216_s26, %s4337_s1 }
 0xafe   : > { %p3377_p13 = scmp.lt.u32.totalorder %s3375_s18, %s3371_s22  ;;  %p3379_p6 = scmp.lt.u32.totalorder %s3371_s22, %s4216_s26 }
 0xaff   : > { %p3373_p4 = pnand %p3372_p9, %p3923_p10 }
 0xb00   : > { %p3378_p2 = por %p3377_p13, %p3376_p7 }
 0xb01   : > { %p3374_p1 = pneg %p3373_p4 }
 0xb02   : > { %p3380_p8 = por %p3379_p6, %p3378_p2 }
 0xb04   : > { %p3381_p11 = pnand %p3380_p8, %p3374_p1 }
 0xb06   : > { %3384 = shalt.err (!%p3381_p11)
}
 0xb07   : > { %2769 = dma.vmem_to_hbm [thread:$0]  (%p3923_p10), %s4218_s19, 128, %s4216_s26, %s2289_s16  }
 0xb08 PF: > { %s4338_s29 = sld [smem:[#allocation38_spill]]  ;;  %s4339_s3 = sld [smem:[#allocation44_spill]] }
 0xb09   : > { %s4340_s23 = sld [smem:[#allocation40_spill]] }
 0xb0e   : > { %s2315_s24 = sand.u32 1, %s4338_s29   ;;  %p4341_p12 = scmp.ne.s32.totalorder %s4339_s3, 0 }
 0xb0f   : > { %p4342_p0 = scmp.ge.s32.totalorder %s4340_s23, 2  ;;  %s2316_s21 = scalar_lea.sflag [#allocation6], %s2315_s24 }
 0xb11   : > { %p2816_p5 = pnand %p4342_p0, %p4341_p12 }
 0xb13   : > { %3446 = dma.done.wait (!%p2816_p5), %s2316_s21, 128  }
 0xb14   : > { %3448 = vsyncadd (!%p2816_p5), %s2316_s21, 4294967168  ;;  %s37_s18 = sadd.s32 1, %s4340_s23   ;;  %s4343_s29 = smov %s3455_s30 }
 0xb15   : > { %p34_p3 = scmp.ge.s32.totalorder %s37_s18, 4   ;;  %s4344_s30 = smov %s3459_s15 }
 0xb16   : > { %s4345_s15 = smov %s3935_s27  ;;  %s4346_s16 = smov %s3467_s17 }
 0xb17   : > { %s4347_s17 = smov %s4349_s14  ;;  %36 = sbr.rel (!%p34_p3) target bundleno = 18 (0x12), region = 178 }
 0xb1e   :  { %2321 = vsyncpa [#allocation5], 1 }
 0xb1f   :  { %2323 = vsyncpa [#allocation5 + $0x1], 1 }
 0xb20   :  { %2324 = vsyncpa [#allocation8], 1 }
 0xb21   :  { %2325 = vsyncpa [#allocation11], 1 }
 0xb22   :  { %2326 = vsyncpa [#allocation14], 1 }
 0xb23   :  { %2327 = vsyncpa [#allocation17], 1 }
 0xb24   :  { %2328 = vsyncpa [#allocation20], 1 }
 0xb25   :  { %2329 = vsyncpa [#allocation23], 1 }
 0xb26   :  { %2330 = vsyncpa [#allocation26], 1 }
 0xb27   :  { %2331 = vsyncpa [#allocation6], 1 }
 0xb28   :  { %2333 = vsyncpa [#allocation6 + $0x1], 1 }

</bundles_post_ra>
